<compile_context>
chip_gen: v7x
topology: tpu7x:2x2x1
jax: 0.10.0
libtpu: 0.0.40
codegen_flags: <defaults>
</compile_context>

<pallas_src>
import functools
import numpy as np
import jax
import jax.numpy as jnp
from jax.experimental import pallas as pl
from jax.experimental.pallas import tpu as pltpu


# ----------------------------------------------------------------------------- #
# Pallas kernel: 2 hidden LagrangianLayers (ReLU) + fused lower-tri/diag head,
# with forward-mode Jacobians w.r.t. q propagated alongside.
# Row layout: row (b * dim_M + k) carries sample b and derivative index k.
# Head column layout: [0, d) = diag head (ReLU + eps), [d, m) = lower head
# (Linear), [m, m_pad) = zero padding (sliced off by the wrapper).
# ----------------------------------------------------------------------------- #
def _mlp_jacobian_kernel(q_ref, w0t_ref, b0_ref, w1t_ref, b1_ref, wh_ref, bh_ref,
                         val_ref, jac_ref, *, epsilon):
    f32 = jnp.float32
    cdt = w0t_ref.dtype                      # matmul operand dtype (bf16 or f32)
    tile_rows, d = q_ref.shape

    # ---- hidden layer 0: dim_M -> n_width (ReLU) ----
    a0 = jnp.dot(q_ref[...], w0t_ref[...], preferred_element_type=f32) + b0_ref[...]
    g0 = (a0 > 0.0).astype(f32)
    y = a0 * g0

    # Layer-0 Jacobian seed: row (b*d + k) must be W0^T[k, :] * g0.  Build the
    # per-row selector in-kernel (iota one-hot, K=d matmul) -- no extra DMA.
    r = jax.lax.broadcasted_iota(jnp.int32, (tile_rows, d), 0)
    c = jax.lax.broadcasted_iota(jnp.int32, (tile_rows, d), 1)
    sel = jnp.where(r % d == c, 1.0, 0.0).astype(cdt)
    jac = jnp.dot(sel, w0t_ref[...], preferred_element_type=f32) * g0

    # ---- hidden layer 1: n_width -> n_width (ReLU) ----
    a1 = jnp.dot(y.astype(cdt), w1t_ref[...], preferred_element_type=f32) + b1_ref[...]
    g1 = (a1 > 0.0).astype(f32)
    jac = jnp.dot(jac.astype(cdt), w1t_ref[...], preferred_element_type=f32) * g1
    y = a1 * g1

    # ---- fused heads (lane-dense, one value matmul + one jac matmul) ----
    h = jnp.dot(y.astype(cdt), wh_ref[...], preferred_element_type=f32) + bh_ref[...]
    jh = jnp.dot(jac.astype(cdt), wh_ref[...], preferred_element_type=f32)

    col = jax.lax.broadcasted_iota(jnp.int32, h.shape, 1)
    is_diag = col < d                         # diag head columns get ReLU + eps
    gate = jnp.where(is_diag, (h > 0.0).astype(f32), 1.0)
    val_ref[...] = h * gate + jnp.where(is_diag, epsilon, 0.0)
    jac_ref[...] = jh * gate


# ----------------------------------------------------------------------------- #
# Shared "tail": from (l_diag, l_lower) and their q-Jacobians to (M, M_inv, c, T)
# ----------------------------------------------------------------------------- #
def _tril_permutation(d):
    m = (d * d + d) // 2
    idx_diag = np.arange(d) + 1
    idx_diag = (idx_diag * (idx_diag + 1)) // 2 - 1
    diag_set = set(int(x) for x in idx_diag)
    idx_tril = np.array([x for x in range(m) if x not in diag_set], dtype=np.int64)
    cat_idx = np.hstack((idx_diag, idx_tril))
    order = np.argsort(cat_idx)
    return np.arange(m)[order]


def _tril_inverse(L):
    """Closed-form (unrolled forward substitution) inverse of batched lower-tri L."""
    d = L.shape[-1]
    inv_diag = 1.0 / jnp.diagonal(L, axis1=-2, axis2=-1)   # (..., d)
    cols = []
    for j in range(d):
        x = [None] * d
        for i in range(d):
            if i < j:
                x[i] = jnp.zeros(L.shape[:-2], L.dtype)
            else:
                s = 1.0 if i == j else 0.0
                for k in range(j, i):
                    s = s - L[..., i, k] * x[k]
                x[i] = s * inv_diag[..., i]
        cols.append(jnp.stack(x, axis=-1))                  # (..., d) over i
    return jnp.stack(cols, axis=-1)                         # (..., i, j)


def _assemble_outputs(qd, l_diag, l_lower, der_l_diag, der_l_lower, d):
    m = (d * d + d) // 2
    idx = jnp.asarray(_tril_permutation(d))
    tril_r, tril_c = np.tril_indices(d)

    def low_tri(vec):  # (..., m) -> (..., d, d) lower triangular
        out = jnp.zeros(vec.shape[:-1] + (d, d), vec.dtype)
        return out.at[..., tril_r, tril_c].set(vec)

    l = jnp.concatenate([l_diag, l_lower], axis=1)[:, idx]
    der_l = jnp.concatenate([der_l_diag, der_l_lower], axis=1)[:, idx, :]

    L = low_tri(l)
    LT = jnp.swapaxes(L, 1, 2)
    M = L @ LT

    # torch.cholesky_inverse(L) == inv(L @ L^T), via closed-form L^-1
    L_inv = _tril_inverse(L)
    M_inv = jnp.swapaxes(L_inv, 1, 2) @ L_inv

    qd3 = qd.reshape(-1, d, 1)
    qd4 = qd.reshape(-1, 1, d, 1)

    Ldt = low_tri(jnp.matmul(der_l, qd3).reshape(-1, m))
    Mdt = L @ jnp.swapaxes(Ldt, 1, 2) + Ldt @ LT

    Ldq = low_tri(jnp.swapaxes(der_l, 2, 1).reshape(-1, m)).reshape(-1, d, d, d)
    Mdq = jnp.matmul(Ldq, LT[:, None]) + jnp.matmul(L[:, None], jnp.swapaxes(Ldq, 2, 3))

    Mdt_qd = jnp.matmul(Mdt, qd3).reshape(-1, d)
    quad_dq = jnp.matmul(jnp.swapaxes(qd4, 2, 3), jnp.matmul(Mdq, qd4)).reshape(-1, d)
    c = Mdt_qd - 0.5 * quad_dq

    M_qd = jnp.matmul(M, qd3).reshape(-1, d)
    T = 0.5 * jnp.matmul(jnp.swapaxes(qd4, 2, 3), M_qd.reshape(-1, 1, d, 1)).reshape(-1)
    return M, M_inv, c, T


# ----------------------------------------------------------------------------- #
# Wrapper
# ----------------------------------------------------------------------------- #
def riemannian_forward(q, qd, params, *, dim_M, n_width=128, epsilon=1e-5,
                       batch_tile=64, compute_dtype=jnp.bfloat16):
    d = dim_M
    m = (d * d + d) // 2
    m_pad = ((m + 127) // 128) * 128            # lane-dense head width (>= 128)
    B = q.shape[0]

    batch_tile = ((max(8, int(batch_tile)) + 7) // 8) * 8   # keep tile_rows % 8 == 0
    Bp = ((B + batch_tile - 1) // batch_tile) * batch_tile
    rows = Bp * d
    tile_rows = batch_tile * d

    W0, b0, W1, b1, Wlo, blo, Wld, bld = params

    q_pad = jnp.zeros((Bp, d), jnp.float32).at[:B].set(q.astype(jnp.float32))
    q_rep = jnp.repeat(q_pad, d, axis=0).astype(compute_dtype)        # (Bp*d, d)

    # Fused head weights: columns [0,d)=diag head, [d,m)=lower head, rest zero.
    wh = (jnp.zeros((n_width, m_pad), jnp.float32)
          .at[:, :d].set(W0.dtype.type(1) * Wld.T)
          .at[:, d:m].set(Wlo.T))
    bh = (jnp.zeros((1, m_pad), jnp.float32)
          .at[0, :d].set(bld)
          .at[0, d:m].set(blo))

    args = (q_rep,
            W0.T.astype(compute_dtype), b0.reshape(1, -1).astype(jnp.float32),
            W1.T.astype(compute_dtype), b1.reshape(1, -1).astype(jnp.float32),
            wh.astype(compute_dtype), bh)

    kernel = functools.partial(_mlp_jacobian_kernel, epsilon=epsilon)
    val_f, jac_f = pl.pallas_call(
        kernel,
        grid=(Bp // batch_tile,),
        in_specs=[
            pl.BlockSpec((tile_rows, d), lambda i: (i, 0)),        # q (replicated rows)
            pl.BlockSpec((d, n_width), lambda i: (0, 0)),          # W0^T
            pl.BlockSpec((1, n_width), lambda i: (0, 0)),          # b0
            pl.BlockSpec((n_width, n_width), lambda i: (0, 0)),    # W1^T
            pl.BlockSpec((1, n_width), lambda i: (0, 0)),          # b1
            pl.BlockSpec((n_width, m_pad), lambda i: (0, 0)),      # fused head W^T
            pl.BlockSpec((1, m_pad), lambda i: (0, 0)),            # fused head bias
        ],
        out_specs=(
            pl.BlockSpec((tile_rows, m_pad), lambda i: (i, 0)),    # head values
            pl.BlockSpec((tile_rows, m_pad), lambda i: (i, 0)),    # head q-jacobians
        ),
        out_shape=(
            jax.ShapeDtypeStruct((rows, m_pad), jnp.float32),
            jax.ShapeDtypeStruct((rows, m_pad), jnp.float32),
        ),
        compiler_params=pltpu.CompilerParams(dimension_semantics=("parallel",)),
    )(*args)

    # Un-flatten: row b*d + k carries d(output)/d q_k for sample b; value rows
    # within a sample are identical (q replicated), take k = 0.
    val = val_f.reshape(Bp, d, m_pad)
    jac = jac_f.reshape(Bp, d, m_pad)
    l_diag = val[:B, 0, :d]                                        # (B, d)  (eps included)
    l_lower = val[:B, 0, d:m]                                      # (B, m-d)
    der_full = jnp.swapaxes(jac[:B, :, :m], 1, 2)                  # (B, m, d) = (out, in)
    der_l_diag = der_full[:, :d, :]                                # (B, d, d)
    der_l_lower = der_full[:, d:, :]                               # (B, m-d, d)

    return _assemble_outputs(qd, l_diag, l_lower, der_l_diag, der_l_lower, d)


# ----------------------------------------------------------------------------- #
# Deterministic parameter init (mimics xavier_normal(gain=sqrt(2)), bias=0.1)
# ----------------------------------------------------------------------------- #
def init_params(key, dim_M, n_width=128, b_init=0.1, b_diag_init=0.1, gain=np.sqrt(2.0)):
    m = (dim_M * dim_M + dim_M) // 2
    llow = m - dim_M
    ks = jax.random.split(key, 4)

    def xavier(k, out_d, in_d):
        std = gain * np.sqrt(2.0 / (in_d + out_d))
        return (std * jax.random.normal(k, (out_d, in_d))).astype(jnp.float32)

    W0 = xavier(ks[0], n_width, dim_M)
    W1 = xavier(ks[1], n_width, n_width)
    Wlo = xavier(ks[2], llow, n_width)
    Wld = xavier(ks[3], dim_M, n_width)
    b0 = jnp.full((n_width,), b_init, jnp.float32)
    b1 = jnp.full((n_width,), b_init, jnp.float32)
    blo = jnp.full((llow,), b_init, jnp.float32)
    bld = jnp.full((dim_M,), b_diag_init, jnp.float32)
    return (W0, b0, W1, b1, Wlo, blo, Wld, bld)


# ----------------------------------------------------------------------------- #
# Pure-JAX reference (same math as the PyTorch module) for a sanity check
# ----------------------------------------------------------------------------- #
def reference_forward(q, qd, params, *, dim_M, epsilon=1e-5):
    d = dim_M
    W0, b0, W1, b1, Wlo, blo, Wld, bld = params
    der = jnp.broadcast_to(jnp.eye(d, dtype=q.dtype), (q.shape[0], d, d))

    def lag_layer(x, der_prev, W, b, relu):
        a = x @ W.T + b
        g = (a > 0).astype(a.dtype) if relu else jnp.ones_like(a)
        der_new = jnp.matmul(g[:, :, None] * W[None], der_prev)
        return a * g if relu else a, der_new

    y, der = lag_layer(q, der, W0, b0, True)
    y, der = lag_layer(y, der, W1, b1, True)
    l_lower, der_l_lower = lag_layer(y, der, Wlo, blo, False)
    l_diag, der_l_diag = lag_layer(y, der, Wld, bld, True)
    l_diag = l_diag + epsilon
    return _assemble_outputs(qd, l_diag, l_lower, der_l_diag, der_l_lower, d)


if __name__ == "__main__":
    dim_M = 4
    batch = 2
    n_width = 128

    key = jax.random.PRNGKey(0)
    kq, kqd, kp = jax.random.split(key, 3)
    q = jax.random.normal(kq, (batch, dim_M), jnp.float32)
    qd = jax.random.normal(kqd, (batch, dim_M), jnp.float32)
    params = init_params(kp, dim_M, n_width)

    # --- f32 path: strict correctness vs the pure-JAX reference ---
    M, M_inv, c, T = riemannian_forward(q, qd, params, dim_M=dim_M, n_width=n_width,
                                        compute_dtype=jnp.float32)
    jax.block_until_ready((M, M_inv, c, T))
    assert M.shape == (batch, dim_M, dim_M)
    assert M_inv.shape == (batch, dim_M, dim_M)
    assert c.shape == (batch, dim_M)
    assert T.shape == (batch,)

    Mr, Mir, cr, Tr = reference_forward(q, qd, params, dim_M=dim_M)
    for got, ref in ((M, Mr), (M_inv, Mir), (c, cr), (T, Tr)):
        np.testing.assert_allclose(np.asarray(got), np.asarray(ref), rtol=5e-2, atol=5e-2)

    # --- validate the closed-form triangular inverse on well-conditioned L ---
    k3, k4 = jax.random.split(jax.random.PRNGKey(3))
    strict = jnp.tril(jax.random.normal(k3, (8, dim_M, dim_M), jnp.float32), -1)
    diag = jnp.abs(jax.random.normal(k4, (8, dim_M), jnp.float32)) + 0.5
    Lt = strict + jnp.eye(dim_M, dtype=jnp.float32) * diag[:, None, :]
    eye_b = jnp.broadcast_to(jnp.eye(dim_M, dtype=jnp.float32), Lt.shape)
    Linv_ref = jax.scipy.linalg.solve_triangular(Lt, eye_b, lower=True)
    np.testing.assert_allclose(np.asarray(_tril_inverse(Lt)), np.asarray(Linv_ref),
                               rtol=1e-4, atol=1e-4)

    # --- bf16 MXU path on a larger batch (multi-step grid, megacore parallel) ---
    B2 = 200
    q2 = jax.random.normal(jax.random.PRNGKey(1), (B2, dim_M), jnp.float32)
    qd2 = jax.random.normal(jax.random.PRNGKey(2), (B2, dim_M), jnp.float32)
    M2, Mi2, c2, T2 = riemannian_forward(q2, qd2, params, dim_M=dim_M, n_width=n_width,
                                         compute_dtype=jnp.bfloat16, batch_tile=64)
    jax.block_until_ready((M2, Mi2, c2, T2))
    assert M2.shape == (B2, dim_M, dim_M) and Mi2.shape == (B2, dim_M, dim_M)
    assert c2.shape == (B2, dim_M) and T2.shape == (B2,)
    for x in (M2, Mi2, c2, T2):
        assert bool(jnp.all(jnp.isfinite(x)))

    print("KERNEL_OK")
</pallas_src>

<mosaic_0001>
module attributes {stable_mosaic.version = 11 : i64} {
  func.func @_mlp_jacobian_kernel(%arg0: i32, %arg1: memref<256x4xf32, #tpu.memory_space<vmem>>, %arg2: memref<4x128xf32, #tpu.memory_space<vmem>>, %arg3: memref<1x128xf32, #tpu.memory_space<vmem>>, %arg4: memref<128x128xf32, #tpu.memory_space<vmem>>, %arg5: memref<1x128xf32, #tpu.memory_space<vmem>>, %arg6: memref<128x128xf32, #tpu.memory_space<vmem>>, %arg7: memref<1x128xf32, #tpu.memory_space<vmem>>, %arg8: memref<256x128xf32, #tpu.memory_space<vmem>>, %arg9: memref<256x128xf32, #tpu.memory_space<vmem>>) attributes {dimension_semantics = [#tpu.dimension_semantics<parallel>], iteration_bounds = array<i64: 1>, scalar_prefetch = 0 : i64, scratch_operands = 0 : i64, tpu.core_type = #tpu.core_type<tc>, window_params = [{transform_indices = @transform_0, window_bounds = array<i64: 256, 4>}, {pipeline_mode = #tpu.pipeline_mode<synchronous>, transform_indices = @transform_1, window_bounds = array<i64: 4, 128>}, {pipeline_mode = #tpu.pipeline_mode<synchronous>, transform_indices = @transform_2, window_bounds = array<i64: 1, 128>}, {pipeline_mode = #tpu.pipeline_mode<synchronous>, transform_indices = @transform_3, window_bounds = array<i64: 128, 128>}, {pipeline_mode = #tpu.pipeline_mode<synchronous>, transform_indices = @transform_4, window_bounds = array<i64: 1, 128>}, {pipeline_mode = #tpu.pipeline_mode<synchronous>, transform_indices = @transform_5, window_bounds = array<i64: 128, 128>}, {pipeline_mode = #tpu.pipeline_mode<synchronous>, transform_indices = @transform_6, window_bounds = array<i64: 1, 128>}, {transform_indices = @transform_7, window_bounds = array<i64: 256, 128>}, {transform_indices = @transform_8, window_bounds = array<i64: 256, 128>}]} {
    %c0 = arith.constant 0 : index
    %c0_0 = arith.constant 0 : index
    %0 = vector.load %arg1[%c0, %c0_0] : memref<256x4xf32, #tpu.memory_space<vmem>>, vector<256x4xf32>
    %c0_1 = arith.constant 0 : index
    %c0_2 = arith.constant 0 : index
    %1 = vector.load %arg2[%c0_1, %c0_2] : memref<4x128xf32, #tpu.memory_space<vmem>>, vector<4x128xf32>
    %cst = arith.constant dense<0.000000e+00> : vector<256x128xf32>
    %2 = tpu.matmul %0, %1, %cst {dimension_numbers = #tpu.dot_dimension_numbers<[1], [0], [0], [1], [0, 0, 1, 1], [], []>} : vector<256x4xf32>, vector<4x128xf32>, vector<256x128xf32> -> vector<256x128xf32>
    %c0_3 = arith.constant 0 : index
    %c0_4 = arith.constant 0 : index
    %3 = vector.load %arg3[%c0_3, %c0_4] : memref<1x128xf32, #tpu.memory_space<vmem>>, vector<1x128xf32>
    %4 = vector.broadcast %3 : vector<1x128xf32> to vector<256x128xf32>
    %5 = arith.addf %2, %4 : vector<256x128xf32>
    %cst_5 = arith.constant 0.000000e+00 : f32
    %6 = vector.broadcast %cst_5 : f32 to vector<256x128xf32>
    %7 = arith.cmpf ogt, %5, %6 : vector<256x128xf32>
    %8 = arith.extui %7 : vector<256x128xi1> to vector<256x128xi32>
    %9 = arith.sitofp %8 : vector<256x128xi32> to vector<256x128xf32>
    %10 = arith.mulf %5, %9 : vector<256x128xf32>
    %11 = tpu.iota {dimensions = array<i32: 0>} : vector<256x4xi32>
    %12 = tpu.iota {dimensions = array<i32: 1>} : vector<256x4xi32>
    %c4_i32 = arith.constant 4 : i32
    %c0_i32 = arith.constant 0 : i32
    %13 = arith.cmpi eq, %c4_i32, %c0_i32 : i32
    %c1_i32 = arith.constant 1 : i32
    %14 = arith.select %13, %c1_i32, %c4_i32 : i32
    %15 = vector.broadcast %14 : i32 to vector<256x4xi32>
    %16 = arith.remsi %11, %15 : vector<256x4xi32>
    %c0_i32_6 = arith.constant 0 : i32
    %17 = vector.broadcast %c0_i32_6 : i32 to vector<256x4xi32>
    %18 = arith.cmpi ne, %16, %17 : vector<256x4xi32>
    %c0_i32_7 = arith.constant 0 : i32
    %19 = vector.broadcast %c0_i32_7 : i32 to vector<256x4xi32>
    %20 = arith.cmpi slt, %16, %19 : vector<256x4xi32>
    %c0_i32_8 = arith.constant 0 : i32
    %21 = arith.cmpi slt, %14, %c0_i32_8 : i32
    %22 = vector.broadcast %21 : i1 to vector<256x4xi1>
    %23 = vector.broadcast %22 : vector<256x4xi1> to vector<256x4xi1>
    %24 = arith.xori %20, %23 : vector<256x4xi1>
    %25 = arith.andi %24, %18 : vector<256x4xi1>
    %26 = vector.broadcast %14 : i32 to vector<256x4xi32>
    %27 = arith.addi %16, %26 : vector<256x4xi32>
    %28 = arith.select %25, %27, %16 : vector<256x4xi1>, vector<256x4xi32>
    %29 = arith.cmpi eq, %28, %12 : vector<256x4xi32>
    %cst_9 = arith.constant 1.000000e+00 : f32
    %cst_10 = arith.constant 0.000000e+00 : f32
    %30 = vector.broadcast %cst_9 : f32 to vector<256x4xf32>
    %31 = vector.broadcast %cst_10 : f32 to vector<256x4xf32>
    %32 = arith.select %29, %30, %31 : vector<256x4xi1>, vector<256x4xf32>
    %c0_11 = arith.constant 0 : index
    %c0_12 = arith.constant 0 : index
    %33 = vector.load %arg2[%c0_11, %c0_12] : memref<4x128xf32, #tpu.memory_space<vmem>>, vector<4x128xf32>
    %cst_13 = arith.constant dense<0.000000e+00> : vector<256x128xf32>
    %34 = tpu.matmul %32, %33, %cst_13 {dimension_numbers = #tpu.dot_dimension_numbers<[1], [0], [0], [1], [0, 0, 1, 1], [], []>} : vector<256x4xf32>, vector<4x128xf32>, vector<256x128xf32> -> vector<256x128xf32>
    %35 = arith.mulf %34, %9 : vector<256x128xf32>
    %c0_14 = arith.constant 0 : index
    %c0_15 = arith.constant 0 : index
    %36 = vector.load %arg4[%c0_14, %c0_15] : memref<128x128xf32, #tpu.memory_space<vmem>>, vector<128x128xf32>
    %cst_16 = arith.constant dense<0.000000e+00> : vector<256x128xf32>
    %37 = tpu.matmul %10, %36, %cst_16 {dimension_numbers = #tpu.dot_dimension_numbers<[1], [0], [0], [1], [0, 0, 1, 1], [], []>} : vector<256x128xf32>, vector<128x128xf32>, vector<256x128xf32> -> vector<256x128xf32>
    %c0_17 = arith.constant 0 : index
    %c0_18 = arith.constant 0 : index
    %38 = vector.load %arg5[%c0_17, %c0_18] : memref<1x128xf32, #tpu.memory_space<vmem>>, vector<1x128xf32>
    %39 = vector.broadcast %38 : vector<1x128xf32> to vector<256x128xf32>
    %40 = arith.addf %37, %39 : vector<256x128xf32>
    %cst_19 = arith.constant 0.000000e+00 : f32
    %41 = vector.broadcast %cst_19 : f32 to vector<256x128xf32>
    %42 = arith.cmpf ogt, %40, %41 : vector<256x128xf32>
    %43 = arith.extui %42 : vector<256x128xi1> to vector<256x128xi32>
    %44 = arith.sitofp %43 : vector<256x128xi32> to vector<256x128xf32>
    %c0_20 = arith.constant 0 : index
    %c0_21 = arith.constant 0 : index
    %45 = vector.load %arg4[%c0_20, %c0_21] : memref<128x128xf32, #tpu.memory_space<vmem>>, vector<128x128xf32>
    %cst_22 = arith.constant dense<0.000000e+00> : vector<256x128xf32>
    %46 = tpu.matmul %35, %45, %cst_22 {dimension_numbers = #tpu.dot_dimension_numbers<[1], [0], [0], [1], [0, 0, 1, 1], [], []>} : vector<256x128xf32>, vector<128x128xf32>, vector<256x128xf32> -> vector<256x128xf32>
    %47 = arith.mulf %46, %44 : vector<256x128xf32>
    %48 = arith.mulf %40, %44 : vector<256x128xf32>
    %c0_23 = arith.constant 0 : index
    %c0_24 = arith.constant 0 : index
    %49 = vector.load %arg6[%c0_23, %c0_24] : memref<128x128xf32, #tpu.memory_space<vmem>>, vector<128x128xf32>
    %cst_25 = arith.constant dense<0.000000e+00> : vector<256x128xf32>
    %50 = tpu.matmul %48, %49, %cst_25 {dimension_numbers = #tpu.dot_dimension_numbers<[1], [0], [0], [1], [0, 0, 1, 1], [], []>} : vector<256x128xf32>, vector<128x128xf32>, vector<256x128xf32> -> vector<256x128xf32>
    %c0_26 = arith.constant 0 : index
    %c0_27 = arith.constant 0 : index
    %51 = vector.load %arg7[%c0_26, %c0_27] : memref<1x128xf32, #tpu.memory_space<vmem>>, vector<1x128xf32>
    %52 = vector.broadcast %51 : vector<1x128xf32> to vector<256x128xf32>
    %53 = arith.addf %50, %52 : vector<256x128xf32>
    %c0_28 = arith.constant 0 : index
    %c0_29 = arith.constant 0 : index
    %54 = vector.load %arg6[%c0_28, %c0_29] : memref<128x128xf32, #tpu.memory_space<vmem>>, vector<128x128xf32>
    %cst_30 = arith.constant dense<0.000000e+00> : vector<256x128xf32>
    %55 = tpu.matmul %47, %54, %cst_30 {dimension_numbers = #tpu.dot_dimension_numbers<[1], [0], [0], [1], [0, 0, 1, 1], [], []>} : vector<256x128xf32>, vector<128x128xf32>, vector<256x128xf32> -> vector<256x128xf32>
    %56 = tpu.iota {dimensions = array<i32: 1>} : vector<256x128xi32>
    %c4_i32_31 = arith.constant 4 : i32
    %57 = vector.broadcast %c4_i32_31 : i32 to vector<256x128xi32>
    %58 = arith.cmpi slt, %56, %57 : vector<256x128xi32>
    %cst_32 = arith.constant 0.000000e+00 : f32
    %59 = vector.broadcast %cst_32 : f32 to vector<256x128xf32>
    %60 = arith.cmpf ogt, %53, %59 : vector<256x128xf32>
    %61 = arith.extui %60 : vector<256x128xi1> to vector<256x128xi32>
    %62 = arith.sitofp %61 : vector<256x128xi32> to vector<256x128xf32>
    %cst_33 = arith.constant 1.000000e+00 : f32
    %63 = vector.broadcast %cst_33 : f32 to vector<256x128xf32>
    %64 = arith.select %58, %62, %63 : vector<256x128xi1>, vector<256x128xf32>
    %65 = arith.mulf %53, %64 : vector<256x128xf32>
    %cst_34 = arith.constant 9.99999974E-6 : f32
    %cst_35 = arith.constant 0.000000e+00 : f32
    %66 = vector.broadcast %cst_34 : f32 to vector<256x128xf32>
    %67 = vector.broadcast %cst_35 : f32 to vector<256x128xf32>
    %68 = arith.select %58, %66, %67 : vector<256x128xi1>, vector<256x128xf32>
    %69 = arith.addf %65, %68 : vector<256x128xf32>
    %c0_36 = arith.constant 0 : index
    %c0_37 = arith.constant 0 : index
    %70 = vector.load %arg8[%c0_36, %c0_37] : memref<256x128xf32, #tpu.memory_space<vmem>>, vector<256x128xf32>
    tpu.vector_store %arg8[%c0_36, %c0_37], %69 {strides = array<i32>} : memref<256x128xf32, #tpu.memory_space<vmem>>, vector<256x128xf32>,
    %71 = arith.mulf %55, %64 : vector<256x128xf32>
    %c0_38 = arith.constant 0 : index
    %c0_39 = arith.constant 0 : index
    %72 = vector.load %arg9[%c0_38, %c0_39] : memref<256x128xf32, #tpu.memory_space<vmem>>, vector<256x128xf32>
    tpu.vector_store %arg9[%c0_38, %c0_39], %71 {strides = array<i32>} : memref<256x128xf32, #tpu.memory_space<vmem>>, vector<256x128xf32>,
    return
  }
  func.func @transform_0(%arg0: i32) -> (i32, i32) {
    %c0_i32 = arith.constant 0 : i32
    %c0_i32_0 = arith.constant 0 : i32
    return %arg0, %c0_i32 : i32, i32
  }
  func.func @transform_1(%arg0: i32) -> (i32, i32) {
    %c0_i32 = arith.constant 0 : i32
    %c0_i32_0 = arith.constant 0 : i32
    %c0_i32_1 = arith.constant 0 : i32
    return %c0_i32, %c0_i32_0 : i32, i32
  }
  func.func @transform_2(%arg0: i32) -> (i32, i32) {
    %c0_i32 = arith.constant 0 : i32
    %c0_i32_0 = arith.constant 0 : i32
    %c0_i32_1 = arith.constant 0 : i32
    return %c0_i32, %c0_i32_0 : i32, i32
  }
  func.func @transform_3(%arg0: i32) -> (i32, i32) {
    %c0_i32 = arith.constant 0 : i32
    %c0_i32_0 = arith.constant 0 : i32
    %c0_i32_1 = arith.constant 0 : i32
    return %c0_i32, %c0_i32_0 : i32, i32
  }
  func.func @transform_4(%arg0: i32) -> (i32, i32) {
    %c0_i32 = arith.constant 0 : i32
    %c0_i32_0 = arith.constant 0 : i32
    %c0_i32_1 = arith.constant 0 : i32
    return %c0_i32, %c0_i32_0 : i32, i32
  }
  func.func @transform_5(%arg0: i32) -> (i32, i32) {
    %c0_i32 = arith.constant 0 : i32
    %c0_i32_0 = arith.constant 0 : i32
    %c0_i32_1 = arith.constant 0 : i32
    return %c0_i32, %c0_i32_0 : i32, i32
  }
  func.func @transform_6(%arg0: i32) -> (i32, i32) {
    %c0_i32 = arith.constant 0 : i32
    %c0_i32_0 = arith.constant 0 : i32
    %c0_i32_1 = arith.constant 0 : i32
    return %c0_i32, %c0_i32_0 : i32, i32
  }
  func.func @transform_7(%arg0: i32) -> (i32, i32) {
    %c0_i32 = arith.constant 0 : i32
    %c0_i32_0 = arith.constant 0 : i32
    return %arg0, %c0_i32 : i32, i32
  }
  func.func @transform_8(%arg0: i32) -> (i32, i32) {
    %c0_i32 = arith.constant 0 : i32
    %c0_i32_0 = arith.constant 0 : i32
    return %arg0, %c0_i32 : i32, i32
  }
}

</mosaic_0001>

<bundles_post_ra>
// kernel: tpu_custom_call.1
= control target key start
LH: loop header
LB: loop body
LE: loop exit
PB: predicated region body
PF: predicated region fallthrough
CT: control target
= control target key end

     0   :  { %14 = vsyncpa [#allocation3], 0  ;;  %vm167_vm0 = vcmask 1043456   ;;  %vm70_vm1 = vcmask 31744   ;;  %v524_v3 = vlaneseq  ;;  %v3812_v19 = vmov 0.0   ;;  %s4597_s0 = inlined_call_operand.vmem [shape: f32[256,4], index: 0, kind: input, shape index: {}]   ;;  %s4598_s1 = inlined_call_operand.vmem [shape: f32[4,128], index: 1, kind: input, shape index: {}]   ;;  %s4599_s2 = inlined_call_operand.vmem [shape: f32[1,128], index: 2, kind: input, shape index: {}]   ;;  %s4600_s3 = inlined_call_operand.vmem [shape: f32[128,128], index: 3, kind: input, shape index: {}]   ;;  %s4601_s4 = inlined_call_operand.vmem [shape: f32[1,128], index: 4, kind: input, shape index: {}]   ;;  %s4602_s5 = inlined_call_operand.vmem [shape: f32[128,128], index: 5, kind: input, shape index: {}]   ;;  %s4603_s6 = inlined_call_operand.vmem [shape: f32[1,128], index: 6, kind: input, shape index: {}]   ;;  %s4604_s7 = inlined_call_operand.hbm [shape: f32[256,128], index: 7, kind: output, shape index: {0}]   ;;  %s4605_s8 = inlined_call_operand.hbm [shape: f32[256,128], index: 8, kind: output, shape index: {1}]  }
   0x1   :  { %v62_v0 = vld [vmem:[%s4598_s1] sm:$0xf]  ;;  %v31_v2 = vld [vmem:[%s4597_s0 + $0x8] sm:$0xff]  ;;  %v32_v4 = vld [vmem:[%s4597_s0 + $0x10] sm:$0xff] }
   0x2   :  { %v30_v1 = vld [vmem:[%s4597_s0] sm:$0xff]  ;;  %3211 = vmatprep.subr.msk.mxu0 %vm167_vm0, %v62_v0  ;;  %3261 = vmatprep.subr.msk.mxu1 %vm167_vm0, %v62_v0  ;;  %v3875_v5 = vshrl.u32 %v524_v3, 7  ;;  %v3877_v6 = vand.u32 127, %v524_v3  ;;  %v33_v7 = vld [vmem:[%s4597_s0 + $0x18] sm:$0xff]  ;;  %v35_v23 = vld [vmem:[%s4597_s0 + $0x28] sm:$0xff] }
   0x3   :  { %3213 = vmatprep.mubr.msk.f32.mxu0 %vm70_vm1, %v30_v1  ;;  %3212 = vmatpush3.msk.msra.mxu0 %vm167_vm0, %v62_v0  ;;  %v34_v12 = vld [vmem:[%s4597_s0 + $0x20] sm:$0xff]  ;;  %v36_v27 = vld [vmem:[%s4597_s0 + $0x30] sm:$0xff]  ;;  %v37_v31 = vld [vmem:[%s4597_s0 + $0x38] sm:$0xff] }
   0x4   :  { %3214 = vmatmul.mubr.msk.f32.vlgmr.msra.gmra.mrb[0].mxu0 %vm70_vm1, %v31_v2  ;;  %3262 = vmatpush3.msk.msra.mxu1 %vm167_vm0, %v62_v0  ;;  %v563_v8 = vand.u32 3, %v3875_v5  ;;  %v526_v9 = vadd.s32 8, %v3875_v5  ;;  %v527_v10 = vadd.s32 16, %v3875_v5  ;;  %v528_v11 = vadd.s32 24, %v3875_v5  ;;  %v38_v35 = vld [vmem:[%s4597_s0 + $0x40] sm:$0xff]  ;;  %v39_v39 = vld [vmem:[%s4597_s0 + $0x48] sm:$0xff] }
   0x5   :  { %3216 = vmatprep.mubr.msk.f32.mxu0 %vm70_vm1, %v32_v4  ;;  %v529_v13 = vadd.s32 32, %v3875_v5  ;;  %v530_v14 = vadd.s32 40, %v3875_v5  ;;  %v531_v15 = vadd.s32 48, %v3875_v5  ;;  %v532_v22 = vadd.s32 56, %v3875_v5  ;;  %v40_v43 = vld [vmem:[%s4597_s0 + $0x50] sm:$0xff] }
   0x6   :  { %vm943_vm2 = vcmp.eq.s32.totalorder %v563_v8, %v3877_v6  ;;  %v570_v16 = vand.u32 3, %v526_v9  ;;  %v577_v17 = vand.u32 3, %v527_v10  ;;  %v584_v18 = vand.u32 3, %v528_v11 }
   0x7   :  { %v975_v20 = vsel %vm943_vm2, 1.0, %v3812_v19  ;;  %v591_v21 = vand.u32 3, %v529_v13  ;;  %v598_v24 = vand.u32 3, %v530_v14  ;;  %v605_v28 = vand.u32 3, %v531_v15 }
   0x8   :  { %3217 = vmatmul.mubr.msk.f32.gmra.mrb[2].mxu0 %vm70_vm1, %v33_v7  ;;  %3263 = vmatprep.mubr.msk.f32.mxu1 %vm70_vm1, %v975_v20  ;;  %vm944_vm3 = vcmp.eq.s32.totalorder %v570_v16, %v3877_v6  ;;  %vm945_vm4 = vcmp.eq.s32.totalorder %v577_v17, %v3877_v6  ;;  %vm946_vm5 = vcmp.eq.s32.totalorder %v584_v18, %v3877_v6  ;;  %v533_v30 = vadd.s32 64, %v3875_v5 }
   0x9   :  { %3219 = vmatprep.mubr.msk.f32.mxu0 %vm70_vm1, %v34_v12  ;;  %v976_v25 = vsel %vm944_vm3, 1.0, %v3812_v19  ;;  %v977_v26 = vsel %vm945_vm4, 1.0, %v3812_v19  ;;  %vm947_vm6 = vcmp.eq.s32.totalorder %v591_v21, %v3877_v6  ;;  %v978_v29 = vsel %vm946_vm5, 1.0, %v3812_v19 }
   0xa   :  { %3264 = vmatmul.mubr.msk.f32.vlgmr.msra.gmra.mrb[0].mxu1 %vm70_vm1, %v976_v25  ;;  %v979_v32 = vsel %vm947_vm6, 1.0, %v3812_v19  ;;  %vm948_vm7 = vcmp.eq.s32.totalorder %v598_v24, %v3877_v6  ;;  %v612_v33 = vand.u32 3, %v532_v22  ;;  %v534_v34 = vadd.s32 72, %v3875_v5 }
   0xb   :  { %3266 = vmatprep.mubr.msk.f32.mxu1 %vm70_vm1, %v977_v26  ;;  %vm949_vm8 = vcmp.eq.s32.totalorder %v605_v28, %v3877_v6  ;;  %v619_v36 = vand.u32 3, %v533_v30  ;;  %v535_v37 = vadd.s32 80, %v3875_v5  ;;  %v980_v38 = vsel %vm948_vm7, 1.0, %v3812_v19 }
   0xc   :  { %3220 = vmatmul.mubr.msk.f32.gmra.mrb[4].mxu0 %vm70_vm1, %v35_v23  ;;  %v981_v40 = vsel %vm949_vm8, 1.0, %v3812_v19  ;;  %vm950_vm9 = vcmp.eq.s32.totalorder %v612_v33, %v3877_v6  ;;  %v626_v41 = vand.u32 3, %v534_v34  ;;  %v536_v42 = vadd.s32 88, %v3875_v5 }
   0xd   :  { %3222 = vmatprep.mubr.msk.f32.mxu0 %vm70_vm1, %v36_v27  ;;  %vm951_vm10 = vcmp.eq.s32.totalorder %v619_v36, %v3877_v6  ;;  %v633_v44 = vand.u32 3, %v535_v37  ;;  %v537_v45 = vadd.s32 96, %v3875_v5 }
   0xe   :  { %3267 = vmatmul.mubr.msk.f32.gmra.mrb[2].mxu1 %vm70_vm1, %v978_v29 }
   0xf   :  { %3269 = vmatprep.mubr.msk.f32.mxu1 %vm70_vm1, %v979_v32 }
  0x10   :  { %3223 = vmatmul.mubr.msk.f32.gmra.mrb[6].mxu0 %vm70_vm1, %v37_v31 }
  0x11   :  { %3225 = vmatprep.mubr.msk.f32.mxu0 %vm70_vm1, %v38_v35 }
  0x12   :  { %3270 = vmatmul.mubr.msk.f32.gmra.mrb[4].mxu1 %vm70_vm1, %v980_v38 }
  0x13   :  { %15 = vsyncpa [#allocation5], 0  ;;  %3272 = vmatprep.mubr.msk.f32.mxu1 %vm70_vm1, %v981_v40  ;;  %v982_v46 = vsel %vm950_vm9, 1.0, %v3812_v19  ;;  %v41_v47 = vld [vmem:[%s4597_s0 + $0x58] sm:$0xff]  ;;  %v983_v48 = vsel %vm951_vm10, 1.0, %v3812_v19  ;;  %vm952_vm11 = vcmp.eq.s32.totalorder %v626_v41, %v3877_v6  ;;  %v640_v49 = vand.u32 3, %v536_v42 }
  0x14   :  { %3226 = vmatmul.mubr.msk.f32.gmra.mrb[8].mxu0 %vm70_vm1, %v39_v39  ;;  %v538_v50 = vadd.s32 104, %v3875_v5  ;;  %v42_v51 = vld [vmem:[%s4597_s0 + $0x60] sm:$0xff]  ;;  %vm953_vm12 = vcmp.eq.s32.totalorder %v633_v44, %v3877_v6  ;;  %v647_v52 = vand.u32 3, %v537_v45  ;;  %v539_v53 = vadd.s32 112, %v3875_v5  ;;  %v43_v55 = vld [vmem:[%s4597_s0 + $0x68] sm:$0xff]  ;;  %v44_v59 = vld [vmem:[%s4597_s0 + $0x70] sm:$0xff] }
  0x15   :  { %3228 = vmatprep.mubr.msk.f32.mxu0 %vm70_vm1, %v40_v43  ;;  %v984_v54 = vsel %vm952_vm11, 1.0, %v3812_v19  ;;  %v985_v56 = vsel %vm953_vm12, 1.0, %v3812_v19  ;;  %vm954_vm13 = vcmp.eq.s32.totalorder %v640_v49, %v3877_v6  ;;  %v540_v58 = vadd.s32 120, %v3875_v5  ;;  %v45_v63 = vld [vmem:[%s4597_s0 + $0x78] sm:$0xff]  ;;  %v46_v3 = vld [vmem:[%s4597_s0 + $0x80] sm:$0xff]  ;;  %v47_v9 = vld [vmem:[%s4597_s0 + $0x88] sm:$0xff] }
  0x16   :  { %3273 = vmatmul.mubr.msk.f32.gmra.mrb[6].mxu1 %vm70_vm1, %v982_v46  ;;  %v654_v57 = vand.u32 3, %v538_v50  ;;  %vm955_vm14 = vcmp.eq.s32.totalorder %v647_v52, %v3877_v6  ;;  %v661_v60 = vand.u32 3, %v539_v53  ;;  %v541_v61 = vadd.s32 128, %v3875_v5  ;;  %v1360_v13 = vld [vmem:[%s4600_s3] sm:$0xff]  ;;  %v1361_v14 = vld [vmem:[%s4600_s3 + $0x8] sm:$0xff]  ;;  %v48_v15 = vld [vmem:[%s4597_s0 + $0x90] sm:$0xff] }
  0x17   :  { %3275 = vmatprep.mubr.msk.f32.mxu1 %vm70_vm1, %v983_v48  ;;  %v986_v62 = vsel %vm954_vm13, 1.0, %v3812_v19  ;;  %v987_v0 = vsel %vm955_vm14, 1.0, %v3812_v19  ;;  %v668_v1 = vand.u32 3, %v540_v58  ;;  %v542_v2 = vadd.s32 136, %v3875_v5  ;;  %v1362_v18 = vld [vmem:[%s4600_s3 + $0x10] sm:$0xff]  ;;  %v1363_v20 = vld [vmem:[%s4600_s3 + $0x18] sm:$0xff] }
  0x18   :  { %3229 = vmatmul.mubr.msk.f32.gmra.mrb[10].mxu0 %vm70_vm1, %v41_v47  ;;  %vm956_vm15 = vcmp.eq.s32.totalorder %v654_v57, %v3877_v6  ;;  %vm957_vm0 = vcmp.eq.s32.totalorder %v661_v60, %v3877_v6  ;;  %v675_v4 = vand.u32 3, %v541_v61  ;;  %v543_v7 = vadd.s32 144, %v3875_v5  ;;  %v49_v24 = vld [vmem:[%s4597_s0 + $0x98] sm:$0xff]  ;;  %v50_v28 = vld [vmem:[%s4597_s0 + $0xa0] sm:$0xff]  ;;  %v1365_v32 = vld [vmem:[%s4600_s3 + $0x28] sm:$0xff]  ;;  %s3814_s18 = smov [#allocation2]  }
  0x19   :  { %3231 = vmatprep.mubr.msk.f32.mxu0 %vm70_vm1, %v42_v51  ;;  %v988_v8 = vsel %vm956_vm15, 1.0, %v3812_v19  ;;  %v989_v10 = vsel %vm957_vm0, 1.0, %v3812_v19  ;;  %vm958_vm2 = vcmp.eq.s32.totalorder %v668_v1, %v3877_v6  ;;  %v682_v11 = vand.u32 3, %v542_v2  ;;  %v1364_v31 = vld [vmem:[%s4600_s3 + $0x20] sm:$0xff]  ;;  %v51_v35 = vld [vmem:[%s4597_s0 + $0xa8] sm:$0xff]  ;;  %v52_v39 = vld [vmem:[%s4597_s0 + $0xb0] sm:$0xff] }
  0x1a   :  { %3276 = vmatmul.mubr.msk.f32.gmra.mrb[8].mxu1 %vm70_vm1, %v984_v54  ;;  %v544_v12 = vadd.s32 152, %v3875_v5  ;;  %vm959_vm3 = vcmp.eq.s32.totalorder %v675_v4, %v3877_v6  ;;  %v689_v16 = vand.u32 3, %v543_v7  ;;  %v545_v17 = vadd.s32 160, %v3875_v5  ;;  %v1366_v42 = vld [vmem:[%s4600_s3 + $0x30] sm:$0xff]  ;;  %v1367_v43 = vld [vmem:[%s4600_s3 + $0x38] sm:$0xff]  ;;  %v54_v50 = vld [vmem:[%s4597_s0 + $0xc0] sm:$0xff] }
  0x1b   :  { %3278 = vmatprep.mubr.msk.f32.mxu1 %vm70_vm1, %v985_v56  ;;  %v990_v21 = vsel %vm958_vm2, 1.0, %v3812_v19  ;;  %v546_v22 = vadd.s32 168, %v3875_v5  ;;  %v3631_v23 = vpack.c.bf16 %v1361_v14, %v1360_v13  ;;  %v991_v25 = vsel %vm959_vm3, 1.0, %v3812_v19  ;;  %v53_v45 = vld [vmem:[%s4597_s0 + $0xb8] sm:$0xff]  ;;  %v1368_v54 = vld [vmem:[%s4600_s3 + $0x40] sm:$0xff]  ;;  %v55_v57 = vld [vmem:[%s4597_s0 + $0xc8] sm:$0xff] }
  0x1c   :  { %3232 = vmatmul.mubr.msk.f32.gmra.mrb[12].mxu0 %vm70_vm1, %v43_v55  ;;  %vm960_vm4 = vcmp.eq.s32.totalorder %v682_v11, %v3877_v6  ;;  %v696_v26 = vand.u32 3, %v544_v12  ;;  %v3635_v27 = vpack.c.bf16 %v1363_v20, %v1362_v18  ;;  %vm961_vm5 = vcmp.eq.s32.totalorder %v689_v16, %v3877_v6  ;;  %v1369_v55 = vld [vmem:[%s4600_s3 + $0x48] sm:$0xff]  ;;  %v1370_v2 = vld [vmem:[%s4600_s3 + $0x50] sm:$0xff]  ;;  %v57_v7 = vld [vmem:[%s4597_s0 + $0xd8] sm:$0xff]  ;;  %s2761_s19 = sshll.u32 %s3814_s18, 4  ;;  %s4566_s19 = int_to_ptr.vmem [resolvable:$true] %s2761_s19 }
  0x1d   :  { %3234 = vmatprep.mubr.msk.f32.mxu0 %vm70_vm1, %v44_v59  ;;  %v703_v29 = vand.u32 3, %v545_v17  ;;  %v547_v30 = vadd.s32 176, %v3875_v5  ;;  %3632 = vmatprep.subr.bf16.mxu0 %v3631_v23  ;;  %v992_v33 = vsel %vm960_vm4, 1.0, %v3812_v19  ;;  %v548_v34 = vadd.s32 184, %v3875_v5  ;;  %v58_v12 = vld [vmem:[%s4597_s0 + $0xe0] sm:$0xff]  ;;  %v1373_v17 = vld [vmem:[%s4600_s3 + $0x68] sm:$0xff] }
  0x1e   :  { %3279 = vmatmul.mubr.msk.f32.gmra.mrb[10].mxu1 %vm70_vm1, %v986_v62  ;;  %3664 = vmatprep.subr.bf16.mxu1 %v3631_v23  ;;  %v993_v36 = vsel %vm961_vm5, 1.0, %v3812_v19  ;;  %vm962_vm6 = vcmp.eq.s32.totalorder %v696_v26, %v3877_v6  ;;  %v710_v37 = vand.u32 3, %v546_v22  ;;  %v3639_v38 = vpack.c.bf16 %v1365_v32, %v1364_v31  ;;  %v56_v62 = vld [vmem:[%s4597_s0 + $0xd0] sm:$0xff]  ;;  %v1372_v16 = vld [vmem:[%s4600_s3 + $0x60] sm:$0xff]  ;;  %v59_v20 = vld [vmem:[%s4597_s0 + $0xe8] sm:$0xff] }
  0x1f   :  { %3281 = vmatprep.mubr.msk.f32.mxu1 %vm70_vm1, %v987_v0  ;;  %3634 = vmatpush3.bf16.msra.mxu0 %v3631_v23  ;;  %vm963_vm7 = vcmp.eq.s32.totalorder %v703_v29, %v3877_v6  ;;  %v717_v40 = vand.u32 3, %v547_v30  ;;  %v549_v41 = vadd.s32 192, %v3875_v5  ;;  %v994_v44 = vsel %vm962_vm6, 1.0, %v3812_v19  ;;  %v1996_v47 = vld [vmem:[%s4602_s5 + $0x18] sm:$0xff] }
  0x20   :  { %3235 = vmatmul.mubr.msk.f32.gmra.mrb[14].mxu0 %vm70_vm1, %v45_v63  ;;  %3636 = vmatprep.subr.bf16.mxu0 %v3635_v27  ;;  %v995_v46 = vsel %vm963_vm7, 1.0, %v3812_v19  ;;  %vm4075_vm8 = vcmp.eq.s32.totalorder %v710_v37, %v3877_v6  ;;  %v724_v48 = vand.u32 3, %v548_v34  ;;  %v550_v49 = vadd.s32 200, %v3875_v5  ;;  %v1375_v34 = vld [vmem:[%s4600_s3 + $0x78] sm:$0xff]  ;;  %v1994_v37 = vld [vmem:[%s4602_s5 + $0x8] sm:$0xff] }
  0x21   :  { %3237 = vmatprep.mubr.msk.f32.mxu0 %vm70_vm1, %v46_v3  ;;  %3666 = vmatpush3.bf16.msra.mxu1 %v3631_v23  ;;  %vm965_vm9 = vcmp.eq.s32.totalorder %v717_v40, %v3877_v6  ;;  %v731_v51 = vand.u32 3, %v549_v41  ;;  %v551_v52 = vadd.s32 208, %v3875_v5  ;;  %v3643_v53 = vpack.c.bf16 %v1367_v43, %v1366_v42  ;;  %v1371_v3 = vld [vmem:[%s4600_s3 + $0x58] sm:$0xff] }
  0x22   :  { %3282 = vmatmul.mubr.msk.f32.gmra.mrb[12].mxu1 %vm70_vm1, %v988_v8  ;;  %3668 = vmatprep.subr.bf16.mxu1 %v3635_v27  ;;  %v996_v56 = vsel %vm4075_vm8, 1.0, %v3812_v19  ;;  %v997_v58 = vsel %vm965_vm9, 1.0, %v3812_v19  ;;  %vm4103_vm10 = vcmp.eq.s32.totalorder %v724_v48, %v3877_v6  ;;  %v738_v60 = vand.u32 3, %v550_v49 }
  0x23   :  { %3284 = vmatprep.mubr.msk.f32.mxu1 %vm70_vm1, %v989_v10  ;;  %3638 = vmatpush3.bf16.msra.mxu0 %v3635_v27  ;;  %v552_v61 = vadd.s32 216, %v3875_v5  ;;  %vm967_vm11 = vcmp.eq.s32.totalorder %v731_v51, %v3877_v6  ;;  %v745_v63 = vand.u32 3, %v551_v52  ;;  %v553_v0 = vadd.s32 224, %v3875_v5 }
  0x24   :  { %3238 = vmatmul.mubr.msk.f32.gmra.mrb[16].mxu0 %vm70_vm1, %v47_v9  ;;  %3640 = vmatprep.subr.bf16.mxu0 %v3639_v38  ;;  %v3647_v1 = vpack.c.bf16 %v1369_v55, %v1368_v54  ;;  %v998_v4 = vsel %vm4103_vm10, 1.0, %v3812_v19  ;;  %v999_v8 = vsel %vm967_vm11, 1.0, %v3812_v19  ;;  %vm4131_vm12 = vcmp.eq.s32.totalorder %v738_v60, %v3877_v6  ;;  %v1997_v60 = vld [vmem:[%s4602_s5 + $0x20] sm:$0xff] }
  0x25   :  { %3240 = vmatprep.mubr.msk.f32.mxu0 %vm70_vm1, %v48_v15  ;;  %3670 = vmatpush3.bf16.msra.mxu1 %v3635_v27  ;;  %v752_v10 = vand.u32 3, %v552_v61  ;;  %v554_v11 = vadd.s32 232, %v3875_v5  ;;  %vm969_vm13 = vcmp.eq.s32.totalorder %v745_v63, %v3877_v6  ;;  %v759_v13 = vand.u32 3, %v553_v0  ;;  %v61_v27 = vld [vmem:[%s4597_s0 + $0xf8] sm:$0xff]  ;;  %v1998_v61 = vld [vmem:[%s4602_s5 + $0x28] sm:$0xff] }
  0x26   :  { %3285 = vmatmul.mubr.msk.f32.gmra.mrb[14].mxu1 %vm70_vm1, %v990_v21  ;;  %3672 = vmatprep.subr.bf16.mxu1 %v3639_v38  ;;  %v555_v14 = vadd.s32 240, %v3875_v5  ;;  %v3651_v15 = vpack.c.bf16 %v1371_v3, %v1370_v2  ;;  %v1000_v18 = vsel %vm4131_vm12, 1.0, %v3812_v19  ;;  %v1001_v21 = vsel %vm969_vm13, 1.0, %v3812_v19 }
  0x27   :  { %3287 = vmatprep.mubr.msk.f32.mxu1 %vm70_vm1, %v991_v25  ;;  %3642 = vmatpush3.bf16.msra.mxu0 %v3639_v38  ;;  %vm970_vm14 = vcmp.eq.s32.totalorder %v752_v10, %v3877_v6  ;;  %v766_v22 = vand.u32 3, %v554_v11  ;;  %v556_v23 = vadd.s32 248, %v3875_v5  ;;  %vm971_vm15 = vcmp.eq.s32.totalorder %v759_v13, %v3877_v6  ;;  %v1999_v13 = vld [vmem:[%s4602_s5 + $0x30] sm:$0xff] }
  0x28   :  { %3241 = vmatmul.mubr.msk.f32.gmra.mrb[18].mxu0 %vm70_vm1, %v49_v24  ;;  %3644 = vmatprep.subr.bf16.mxu0 %v3643_v53  ;;  %v60_v24 = vld [vmem:[%s4597_s0 + $0xf0] sm:$0xff]  ;;  %v773_v25 = vand.u32 3, %v555_v14  ;;  %v3655_v26 = vpack.c.bf16 %v1373_v17, %v1372_v16  ;;  %v1002_v5 = vsel %vm970_vm14, 1.0, %v3812_v19  ;;  %v2000_v14 = vld [vmem:[%s4602_s5 + $0x38] sm:$0xff] }
  0x29   :  { %3243 = vmatprep.mubr.msk.f32.mxu0 %vm70_vm1, %v50_v28  ;;  %3674 = vmatpush3.bf16.msra.mxu1 %v3639_v38  ;;  %v1003_v28 = vsel %vm971_vm15, 1.0, %v3812_v19  ;;  %vm972_vm0 = vcmp.eq.s32.totalorder %v766_v22, %v3877_v6  ;;  %v780_v29 = vand.u32 3, %v556_v23 }
  0x2a   :  { %3288 = vmatmul.mubr.msk.f32.gmra.mrb[16].mxu1 %vm70_vm1, %v992_v33  ;;  %3676 = vmatprep.subr.bf16.mxu1 %v3643_v53  ;;  %vm973_vm2 = vcmp.eq.s32.totalorder %v773_v25, %v3877_v6  ;;  %v1004_v30 = vsel %vm972_vm0, 1.0, %v3812_v19  ;;  %v1374_v33 = vld [vmem:[%s4600_s3 + $0x70] sm:$0xff] }
  0x2b   :  { %3290 = vmatprep.mubr.msk.f32.mxu1 %vm70_vm1, %v993_v36  ;;  %3646 = vmatpush3.bf16.msra.mxu0 %v3643_v53  ;;  %v1005_v31 = vsel %vm973_vm2, 1.0, %v3812_v19  ;;  %vm974_vm3 = vcmp.eq.s32.totalorder %v780_v29, %v3877_v6  ;;  %v1993_v36 = vld [vmem:[%s4602_s5] sm:$0xff]  ;;  %v2002_v29 = vld [vmem:[%s4602_s5 + $0x48] sm:$0xff] }
  0x2c   :  { %3244 = vmatmul.mubr.msk.f32.gmra.mrb[20].mxu0 %vm70_vm1, %v51_v35  ;;  %3648 = vmatprep.subr.bf16.mxu0 %v3647_v1  ;;  %v1006_v32 = vsel %vm974_vm3, 1.0, %v3812_v19  ;;  %v3659_v35 = vpack.c.bf16 %v1375_v34, %v1374_v33  ;;  %v3695_v38 = vpack.c.bf16 %v1994_v37, %v1993_v36 }
  0x2d   :  { %3246 = vmatprep.mubr.msk.f32.mxu0 %vm70_vm1, %v52_v39  ;;  %3678 = vmatpush3.bf16.msra.mxu1 %v3643_v53  ;;  %v4200_v39 = vld [vmem:[%s4599_s2] ss:$0 sm:$0xff] }
  0x2e   :  { %3291 = vmatmul.mubr.msk.f32.gmra.mrb[18].mxu1 %vm70_vm1, %v994_v44  ;;  %3680 = vmatprep.subr.bf16.mxu1 %v3647_v1 }
  0x2f   :  { %3293 = vmatprep.mubr.msk.f32.mxu1 %vm70_vm1, %v995_v46  ;;  %3650 = vmatpush3.bf16.msra.mxu0 %v3647_v1  ;;  %v1995_v46 = vld [vmem:[%s4602_s5 + $0x10] sm:$0xff] }
  0x30   :  { %3247 = vmatmul.mubr.msk.f32.gmra.mrb[22].mxu0 %vm70_vm1, %v53_v45  ;;  %3652 = vmatprep.subr.bf16.mxu0 %v3651_v15  ;;  %v3699_v55 = vpack.c.bf16 %v1996_v47, %v1995_v46 }
  0x31   :  { %3249 = vmatprep.mubr.msk.f32.mxu0 %vm70_vm1, %v54_v50  ;;  %3682 = vmatpush3.bf16.msra.mxu1 %v3647_v1 }
  0x32   :  { %3294 = vmatmul.mubr.msk.f32.gmra.mrb[20].mxu1 %vm70_vm1, %v996_v56  ;;  %3684 = vmatprep.subr.bf16.mxu1 %v3651_v15 }
  0x33   :  { %3296 = vmatprep.mubr.msk.f32.mxu1 %vm70_vm1, %v997_v58  ;;  %3654 = vmatpush3.bf16.msra.mxu0 %v3651_v15 }
  0x34   :  { %3250 = vmatmul.mubr.msk.f32.gmra.mrb[24].mxu0 %vm70_vm1, %v55_v57  ;;  %3656 = vmatprep.subr.bf16.mxu0 %v3655_v26 }
  0x35   :  { %3252 = vmatprep.mubr.msk.f32.mxu0 %vm70_vm1, %v56_v62  ;;  %3686 = vmatpush3.bf16.msra.mxu1 %v3651_v15 }
  0x36   :  { %3297 = vmatmul.mubr.msk.f32.gmra.mrb[22].mxu1 %vm70_vm1, %v998_v4  ;;  %3688 = vmatprep.subr.bf16.mxu1 %v3655_v26 }
  0x37   :  { %3299 = vmatprep.mubr.msk.f32.mxu1 %vm70_vm1, %v999_v8  ;;  %3658 = vmatpush3.bf16.msra.mxu0 %v3655_v26  ;;  %v4224_v8 = vpack.c.bf16 %v1998_v61, %v1997_v60  ;;  %v2006_v60 = vld [vmem:[%s4602_s5 + $0x68] sm:$0xff] }
  0x38   :  { %3253 = vmatmul.mubr.msk.f32.gmra.mrb[26].mxu0 %vm70_vm1, %v57_v7  ;;  %3660 = vmatprep.subr.bf16.mxu0 %v3659_v35 }
  0x39   :  { %3255 = vmatprep.mubr.msk.f32.mxu0 %vm70_vm1, %v58_v12  ;;  %3690 = vmatpush3.bf16.msra.mxu1 %v3655_v26 }
  0x3a   :  { %3300 = vmatmul.mubr.msk.f32.gmra.mrb[24].mxu1 %vm70_vm1, %v1000_v18  ;;  %3692 = vmatprep.subr.bf16.mxu1 %v3659_v35 }
  0x3b   :  { %3302 = vmatprep.mubr.msk.f32.mxu1 %vm70_vm1, %v1001_v21  ;;  %3662 = vmatpush3.bf16.msra.mxu0 %v3659_v35 }
  0x3c   :  { %3256 = vmatmul.mubr.msk.f32.gmra.mrb[28].mxu0 %vm70_vm1, %v59_v20  ;;  %3696 = vmatprep.subr.bf16.mxu0 %v3695_v38 }
  0x3d   :  { %3258 = vmatprep.mubr.msk.f32.mxu0 %vm70_vm1, %v60_v24  ;;  %3694 = vmatpush3.bf16.msra.mxu1 %v3659_v35  ;;  %v4237_v24 = vpack.c.bf16 %v2000_v14, %v1999_v13 }
  0x3e   :  { %3303 = vmatmul.mubr.msk.f32.gmra.mrb[26].mxu1 %vm70_vm1, %v1002_v5  ;;  %3728 = vmatprep.subr.bf16.mxu1 %v3695_v38 }
  0x3f   :  { %3305 = vmatprep.mubr.msk.f32.mxu1 %vm70_vm1, %v1003_v28  ;;  %v2001_v28 = vld [vmem:[%s4602_s5 + $0x40] sm:$0xff] }
  0x40   :  { %3259 = vmatmul.mubr.msk.f32.gmra.mrb[30].mxu0 %vm70_vm1, %v61_v27 }
  0x42   :  { %3306 = vmatmul.mubr.msk.f32.gmra.mrb[28].mxu1 %vm70_vm1, %v1004_v30 }
  0x43   :  { %3308 = vmatprep.mubr.msk.f32.mxu1 %vm70_vm1, %v1005_v31 }
  0x46   :  { %3309 = vmatmul.mubr.msk.f32.gmra.mrb[30].mxu1 %vm70_vm1, %v1006_v32 }
  0xd7   :  { %v3215_v40 = vpop.f32.mrb[0].mxu0 }
  0xd8   :  { %v243_v41 = vadd.f32 %v3215_v40, %v4200_v39  ;;  %v237_v42 = vpop.f32.mrb[1].mxu0 }
  0xd9   :  { %v238_v43 = vadd.f32 %v4200_v39, %v237_v42 }
  0xda   :  { %vm397_vm1 = vcmp.gt.f32.partialorder %v243_v41, 0.0 }
  0xdb   :  { %v3218_v44 = vpop.f32.mrb[2].mxu0  ;;  %v2823_v45 = vsel %vm397_vm1, 1.0, %v3812_v19  ;;  %vm396_vm4 = vcmp.gt.f32.partialorder %v238_v43, 0.0 }
  0xdc   :  { %v253_v48 = vadd.f32 %v3218_v44, %v4200_v39  ;;  %v247_v49 = vpop.f32.mrb[3].mxu0  ;;  %v2822_v50 = vsel %vm396_vm4, 1.0, %v3812_v19  ;;  %v493_v53 = vmul.f32 %v2823_v45, %v243_v41  ;;  %v2003_v44 = vld [vmem:[%s4602_s5 + $0x50] sm:$0xff] }
  0xdd   :  { %v248_v51 = vadd.f32 %v4200_v39, %v247_v49  ;;  %v492_v52 = vmul.f32 %v2822_v50, %v238_v43  ;;  %v3265_v54 = vpop.f32.mrb[0].mxu1 }
  0xde   :  { %vm399_vm5 = vcmp.gt.f32.partialorder %v253_v48, 0.0  ;;  %v1329_v56 = vmul.f32 %v3265_v54, %v2823_v45  ;;  %v1169_v58 = vpop.f32.mrb[1].mxu1  ;;  %v2004_v45 = vld [vmem:[%s4602_s5 + $0x58] sm:$0xff] }
  0xdf   :  { %v3221_v57 = vpop.f32.mrb[4].mxu0  ;;  %3343 = vmatprep.mubr.f32.mxu0 %v492_v52  ;;  %v2825_v59 = vsel %vm399_vm5, 1.0, %v3812_v19  ;;  %vm398_vm6 = vcmp.gt.f32.partialorder %v248_v51, 0.0  ;;  %v1328_v63 = vmul.f32 %v2822_v50, %v1169_v58  ;;  %v3715_v54 = vpack.c.bf16 %v2004_v45, %v2003_v44 }
  0xe0   :  { %v263_v62 = vadd.f32 %v3221_v57, %v4200_v39  ;;  %v257_v0 = vpop.f32.mrb[5].mxu0  ;;  %3344 = vmatmul.mubr.f32.vlgmr.msra.gmra.mrb[32].mxu0 %v493_v53  ;;  %v2824_v1 = vsel %vm398_vm6, 1.0, %v3812_v19  ;;  %v495_v4 = vmul.f32 %v2825_v59, %v253_v48 }
  0xe1   :  { %v258_v2 = vadd.f32 %v4200_v39, %v257_v0  ;;  %v494_v3 = vmul.f32 %v2824_v1, %v248_v51  ;;  %3698 = vmatpush3.bf16.msra.mxu0 %v3695_v38  ;;  %v3268_v7 = vpop.f32.mrb[2].mxu1  ;;  %3423 = vmatprep.mubr.f32.mxu1 %v1328_v63 }
  0xe2   :  { %vm401_vm7 = vcmp.gt.f32.partialorder %v263_v62, 0.0  ;;  %3700 = vmatprep.subr.bf16.mxu0 %v3699_v55  ;;  %v1331_v9 = vmul.f32 %v3268_v7, %v2825_v59  ;;  %v1179_v11 = vpop.f32.mrb[3].mxu1  ;;  %3424 = vmatmul.mubr.f32.vlgmr.msra.gmra.mrb[32].mxu1 %v1329_v56  ;;  %v2005_v59 = vld [vmem:[%s4602_s5 + $0x60] sm:$0xff] }
  0xe3   :  { %v3224_v10 = vpop.f32.mrb[6].mxu0  ;;  %3346 = vmatprep.mubr.f32.mxu0 %v494_v3  ;;  %v2827_v12 = vsel %vm401_vm7, 1.0, %v3812_v19  ;;  %vm400_vm8 = vcmp.gt.f32.partialorder %v258_v2, 0.0  ;;  %v1330_v16 = vmul.f32 %v2824_v1, %v1179_v11  ;;  %3730 = vmatpush3.bf16.msra.mxu1 %v3695_v38  ;;  %v4252_v38 = vpack.c.bf16 %v2002_v29, %v2001_v28 }
  0xe4   :  { %v273_v15 = vadd.f32 %v3224_v10, %v4200_v39  ;;  %v267_v17 = vpop.f32.mrb[7].mxu0  ;;  %3347 = vmatmul.mubr.f32.gmra.mrb[34].mxu0 %v495_v4  ;;  %v2826_v18 = vsel %vm400_vm8, 1.0, %v3812_v19  ;;  %3732 = vmatprep.subr.bf16.mxu1 %v3699_v55  ;;  %v497_v22 = vmul.f32 %v2827_v12, %v263_v62  ;;  %v3719_v7 = vpack.c.bf16 %v2006_v60, %v2005_v59 }
  0xe5   :  { %v268_v20 = vadd.f32 %v4200_v39, %v267_v17  ;;  %v496_v21 = vmul.f32 %v2826_v18, %v258_v2  ;;  %3702 = vmatpush3.bf16.msra.mxu0 %v3699_v55  ;;  %v3271_v23 = vpop.f32.mrb[4].mxu1  ;;  %3426 = vmatprep.mubr.f32.mxu1 %v1330_v16 }
  0xe6   :  { %vm403_vm9 = vcmp.gt.f32.partialorder %v273_v15, 0.0  ;;  %3704 = vmatprep.subr.bf16.mxu0 %v4224_v8  ;;  %v1333_v25 = vmul.f32 %v3271_v23, %v2827_v12  ;;  %v1189_v5 = vpop.f32.mrb[5].mxu1  ;;  %3427 = vmatmul.mubr.f32.gmra.mrb[34].mxu1 %v1331_v9 }
  0xe7   :  { %v3227_v26 = vpop.f32.mrb[8].mxu0  ;;  %3349 = vmatprep.mubr.f32.mxu0 %v496_v21  ;;  %v2829_v27 = vsel %vm403_vm9, 1.0, %v3812_v19  ;;  %vm402_vm10 = vcmp.gt.f32.partialorder %v268_v20, 0.0  ;;  %v1332_v31 = vmul.f32 %v2826_v18, %v1189_v5  ;;  %3734 = vmatpush3.bf16.msra.mxu1 %v3699_v55 }
  0xe8   :  { %v283_v30 = vadd.f32 %v3227_v26, %v4200_v39  ;;  %v277_v32 = vpop.f32.mrb[9].mxu0  ;;  %3350 = vmatmul.mubr.f32.gmra.mrb[36].mxu0 %v497_v22  ;;  %v2828_v33 = vsel %vm402_vm10, 1.0, %v3812_v19  ;;  %3736 = vmatprep.subr.bf16.mxu1 %v4224_v8  ;;  %v499_v36 = vmul.f32 %v2829_v27, %v273_v15 }
  0xe9   :  { %v278_v34 = vadd.f32 %v4200_v39, %v277_v32  ;;  %v498_v35 = vmul.f32 %v2828_v33, %v268_v20  ;;  %3706 = vmatpush3.bf16.msra.mxu0 %v4224_v8  ;;  %v3274_v37 = vpop.f32.mrb[6].mxu1  ;;  %3429 = vmatprep.mubr.f32.mxu1 %v1332_v31 }
  0xea   :  { %vm405_vm11 = vcmp.gt.f32.partialorder %v283_v30, 0.0  ;;  %3708 = vmatprep.subr.bf16.mxu0 %v4237_v24  ;;  %v1335_v40 = vmul.f32 %v3274_v37, %v2829_v27  ;;  %v1199_v42 = vpop.f32.mrb[7].mxu1  ;;  %3430 = vmatmul.mubr.f32.gmra.mrb[36].mxu1 %v1333_v25 }
  0xeb   :  { %v3230_v41 = vpop.f32.mrb[10].mxu0  ;;  %3352 = vmatprep.mubr.f32.mxu0 %v498_v35  ;;  %v2831_v43 = vsel %vm405_vm11, 1.0, %v3812_v19  ;;  %vm404_vm12 = vcmp.gt.f32.partialorder %v278_v34, 0.0  ;;  %v1334_v47 = vmul.f32 %v2828_v33, %v1199_v42  ;;  %3738 = vmatpush3.bf16.msra.mxu1 %v4224_v8 }
  0xec   :  { %v293_v46 = vadd.f32 %v3230_v41, %v4200_v39  ;;  %v287_v48 = vpop.f32.mrb[11].mxu0  ;;  %3353 = vmatmul.mubr.f32.gmra.mrb[38].mxu0 %v499_v36  ;;  %v2830_v49 = vsel %vm404_vm12, 1.0, %v3812_v19  ;;  %3740 = vmatprep.subr.bf16.mxu1 %v4237_v24  ;;  %v501_v52 = vmul.f32 %v2831_v43, %v283_v30 }
  0xed   :  { %v288_v50 = vadd.f32 %v4200_v39, %v287_v48  ;;  %v500_v51 = vmul.f32 %v2830_v49, %v278_v34  ;;  %3710 = vmatpush3.bf16.msra.mxu0 %v4237_v24  ;;  %v3277_v53 = vpop.f32.mrb[8].mxu1  ;;  %3432 = vmatprep.mubr.f32.mxu1 %v1334_v47 }
  0xee   :  { %vm407_vm13 = vcmp.gt.f32.partialorder %v293_v46, 0.0  ;;  %3712 = vmatprep.subr.bf16.mxu0 %v4252_v38  ;;  %v1337_v55 = vmul.f32 %v3277_v53, %v2831_v43  ;;  %v1209_v57 = vpop.f32.mrb[9].mxu1  ;;  %3433 = vmatmul.mubr.f32.gmra.mrb[38].mxu1 %v1335_v40 }
  0xef   :  { %v3233_v56 = vpop.f32.mrb[12].mxu0  ;;  %3355 = vmatprep.mubr.f32.mxu0 %v500_v51  ;;  %v2833_v58 = vsel %vm407_vm13, 1.0, %v3812_v19  ;;  %vm406_vm14 = vcmp.gt.f32.partialorder %v288_v50, 0.0  ;;  %v1336_v62 = vmul.f32 %v2830_v49, %v1209_v57  ;;  %3742 = vmatpush3.bf16.msra.mxu1 %v4237_v24 }
  0xf0   :  { %v303_v61 = vadd.f32 %v3233_v56, %v4200_v39  ;;  %v297_v63 = vpop.f32.mrb[13].mxu0  ;;  %3356 = vmatmul.mubr.f32.gmra.mrb[40].mxu0 %v501_v52  ;;  %v2832_v0 = vsel %vm406_vm14, 1.0, %v3812_v19  ;;  %3744 = vmatprep.subr.bf16.mxu1 %v4252_v38  ;;  %v503_v3 = vmul.f32 %v2833_v58, %v293_v46 }
  0xf1   :  { %v298_v1 = vadd.f32 %v4200_v39, %v297_v63  ;;  %v502_v2 = vmul.f32 %v2832_v0, %v288_v50  ;;  %3714 = vmatpush3.bf16.msra.mxu0 %v4252_v38  ;;  %v3280_v4 = vpop.f32.mrb[10].mxu1  ;;  %3435 = vmatprep.mubr.f32.mxu1 %v1336_v62 }
  0xf2   :  { %vm409_vm15 = vcmp.gt.f32.partialorder %v303_v61, 0.0  ;;  %3716 = vmatprep.subr.bf16.mxu0 %v3715_v54  ;;  %v1339_v8 = vmul.f32 %v3280_v4, %v2833_v58  ;;  %v1219_v10 = vpop.f32.mrb[11].mxu1  ;;  %3436 = vmatmul.mubr.f32.gmra.mrb[40].mxu1 %v1337_v55 }
  0xf3   :  { %v3236_v9 = vpop.f32.mrb[14].mxu0  ;;  %3358 = vmatprep.mubr.f32.mxu0 %v502_v2  ;;  %v2835_v11 = vsel %vm409_vm15, 1.0, %v3812_v19  ;;  %vm408_vm0 = vcmp.gt.f32.partialorder %v298_v1, 0.0  ;;  %v1338_v13 = vmul.f32 %v2832_v0, %v1219_v10  ;;  %3746 = vmatpush3.bf16.msra.mxu1 %v4252_v38 }
  0xf4   :  { %v313_v12 = vadd.f32 %v3236_v9, %v4200_v39  ;;  %v307_v14 = vpop.f32.mrb[15].mxu0  ;;  %3359 = vmatmul.mubr.f32.gmra.mrb[42].mxu0 %v503_v3  ;;  %v2834_v15 = vsel %vm408_vm0, 1.0, %v3812_v19  ;;  %3748 = vmatprep.subr.bf16.mxu1 %v3715_v54  ;;  %v505_v18 = vmul.f32 %v2835_v11, %v303_v61 }
  0xf5   :  { %v308_v16 = vadd.f32 %v4200_v39, %v307_v14  ;;  %v504_v17 = vmul.f32 %v2834_v15, %v298_v1  ;;  %3718 = vmatpush3.bf16.msra.mxu0 %v3715_v54  ;;  %v3283_v20 = vpop.f32.mrb[12].mxu1  ;;  %3438 = vmatprep.mubr.f32.mxu1 %v1338_v13 }
  0xf6   :  { %vm411_vm2 = vcmp.gt.f32.partialorder %v313_v12, 0.0  ;;  %3720 = vmatprep.subr.bf16.mxu0 %v3719_v7  ;;  %v1341_v21 = vmul.f32 %v3283_v20, %v2835_v11  ;;  %v1229_v23 = vpop.f32.mrb[13].mxu1  ;;  %3439 = vmatmul.mubr.f32.gmra.mrb[42].mxu1 %v1339_v8 }
  0xf7   :  { %v3239_v22 = vpop.f32.mrb[16].mxu0  ;;  %3361 = vmatprep.mubr.f32.mxu0 %v504_v17  ;;  %v2837_v24 = vsel %vm411_vm2, 1.0, %v3812_v19  ;;  %vm410_vm3 = vcmp.gt.f32.partialorder %v308_v16, 0.0  ;;  %v1340_v26 = vmul.f32 %v2834_v15, %v1229_v23  ;;  %3750 = vmatpush3.bf16.msra.mxu1 %v3715_v54 }
  0xf8   :  { %v323_v25 = vadd.f32 %v3239_v22, %v4200_v39  ;;  %v317_v5 = vpop.f32.mrb[17].mxu0  ;;  %3362 = vmatmul.mubr.f32.gmra.mrb[44].mxu0 %v505_v18  ;;  %v2836_v27 = vsel %vm410_vm3, 1.0, %v3812_v19  ;;  %3752 = vmatprep.subr.bf16.mxu1 %v3719_v7  ;;  %v507_v30 = vmul.f32 %v2837_v24, %v313_v12 }
  0xf9   :  { %v318_v28 = vadd.f32 %v4200_v39, %v317_v5  ;;  %v506_v29 = vmul.f32 %v2836_v27, %v308_v16  ;;  %3722 = vmatpush3.bf16.msra.mxu0 %v3719_v7  ;;  %v3286_v31 = vpop.f32.mrb[14].mxu1  ;;  %3441 = vmatprep.mubr.f32.mxu1 %v1340_v26 }
  0xfa   :  { %vm413_vm1 = vcmp.gt.f32.partialorder %v323_v25, 0.0  ;;  %v1343_v32 = vmul.f32 %v3286_v31, %v2837_v24  ;;  %v1239_v34 = vpop.f32.mrb[15].mxu1  ;;  %3442 = vmatmul.mubr.f32.gmra.mrb[44].mxu1 %v1341_v21 }
  0xfb   :  { %v3242_v33 = vpop.f32.mrb[18].mxu0  ;;  %3364 = vmatprep.mubr.f32.mxu0 %v506_v29  ;;  %v2839_v35 = vsel %vm413_vm1, 1.0, %v3812_v19  ;;  %vm412_vm4 = vcmp.gt.f32.partialorder %v318_v28, 0.0  ;;  %v1342_v37 = vmul.f32 %v2836_v27, %v1239_v34  ;;  %3754 = vmatpush3.bf16.msra.mxu1 %v3719_v7 }
  0xfc   :  { %v333_v36 = vadd.f32 %v3242_v33, %v4200_v39  ;;  %v327_v38 = vpop.f32.mrb[19].mxu0  ;;  %3365 = vmatmul.mubr.f32.gmra.mrb[46].mxu0 %v507_v30  ;;  %v2838_v40 = vsel %vm412_vm4, 1.0, %v3812_v19  ;;  %v509_v43 = vmul.f32 %v2839_v35, %v323_v25 }
  0xfd   :  { %v328_v41 = vadd.f32 %v4200_v39, %v327_v38  ;;  %v508_v42 = vmul.f32 %v2838_v40, %v318_v28  ;;  %v3289_v44 = vpop.f32.mrb[16].mxu1  ;;  %3444 = vmatprep.mubr.f32.mxu1 %v1342_v37 }
  0xfe   :  { %vm415_vm5 = vcmp.gt.f32.partialorder %v333_v36, 0.0  ;;  %v1345_v45 = vmul.f32 %v3289_v44, %v2839_v35  ;;  %v1249_v47 = vpop.f32.mrb[17].mxu1  ;;  %3445 = vmatmul.mubr.f32.gmra.mrb[46].mxu1 %v1343_v32 }
  0xff   :  { %v3245_v46 = vpop.f32.mrb[20].mxu0  ;;  %3367 = vmatprep.mubr.f32.mxu0 %v508_v42  ;;  %v2841_v48 = vsel %vm415_vm5, 1.0, %v3812_v19  ;;  %vm414_vm6 = vcmp.gt.f32.partialorder %v328_v41, 0.0  ;;  %v1344_v50 = vmul.f32 %v2838_v40, %v1249_v47 }
 0x100   :  { %v343_v49 = vadd.f32 %v3245_v46, %v4200_v39  ;;  %v337_v51 = vpop.f32.mrb[21].mxu0  ;;  %3368 = vmatmul.mubr.f32.gmra.mrb[48].mxu0 %v509_v43  ;;  %v2840_v52 = vsel %vm414_vm6, 1.0, %v3812_v19  ;;  %v511_v55 = vmul.f32 %v2841_v48, %v333_v36 }
 0x101   :  { %v338_v53 = vadd.f32 %v4200_v39, %v337_v51  ;;  %v510_v54 = vmul.f32 %v2840_v52, %v328_v41  ;;  %v3292_v56 = vpop.f32.mrb[18].mxu1  ;;  %3447 = vmatprep.mubr.f32.mxu1 %v1344_v50 }
 0x102   :  { %vm417_vm7 = vcmp.gt.f32.partialorder %v343_v49, 0.0  ;;  %v1347_v57 = vmul.f32 %v3292_v56, %v2841_v48  ;;  %v1259_v59 = vpop.f32.mrb[19].mxu1  ;;  %3448 = vmatmul.mubr.f32.gmra.mrb[48].mxu1 %v1345_v45 }
 0x103   :  { %v3248_v58 = vpop.f32.mrb[22].mxu0  ;;  %3370 = vmatprep.mubr.f32.mxu0 %v510_v54  ;;  %v2843_v60 = vsel %vm417_vm7, 1.0, %v3812_v19  ;;  %vm416_vm8 = vcmp.gt.f32.partialorder %v338_v53, 0.0  ;;  %v1346_v62 = vmul.f32 %v2840_v52, %v1259_v59 }
 0x104   :  { %v353_v61 = vadd.f32 %v3248_v58, %v4200_v39  ;;  %v347_v63 = vpop.f32.mrb[23].mxu0  ;;  %3371 = vmatmul.mubr.f32.gmra.mrb[50].mxu0 %v511_v55  ;;  %v2842_v0 = vsel %vm416_vm8, 1.0, %v3812_v19  ;;  %v513_v3 = vmul.f32 %v2843_v60, %v343_v49 }
 0x105   :  { %v348_v1 = vadd.f32 %v4200_v39, %v347_v63  ;;  %v512_v2 = vmul.f32 %v2842_v0, %v338_v53  ;;  %v3295_v4 = vpop.f32.mrb[20].mxu1  ;;  %3450 = vmatprep.mubr.f32.mxu1 %v1346_v62 }
 0x106   :  { %vm419_vm9 = vcmp.gt.f32.partialorder %v353_v61, 0.0  ;;  %v1349_v7 = vmul.f32 %v3295_v4, %v2843_v60  ;;  %v1269_v9 = vpop.f32.mrb[21].mxu1  ;;  %3451 = vmatmul.mubr.f32.gmra.mrb[50].mxu1 %v1347_v57 }
 0x107   :  { %v3251_v8 = vpop.f32.mrb[24].mxu0  ;;  %3373 = vmatprep.mubr.f32.mxu0 %v512_v2  ;;  %v2845_v10 = vsel %vm419_vm9, 1.0, %v3812_v19  ;;  %vm418_vm10 = vcmp.gt.f32.partialorder %v348_v1, 0.0  ;;  %v1348_v12 = vmul.f32 %v2842_v0, %v1269_v9  ;;  %v2007_v2 = vld [vmem:[%s4602_s5 + $0x70] sm:$0xff] }
 0x108   :  { %v363_v11 = vadd.f32 %v3251_v8, %v4200_v39  ;;  %v357_v13 = vpop.f32.mrb[25].mxu0  ;;  %3374 = vmatmul.mubr.f32.gmra.mrb[52].mxu0 %v513_v3  ;;  %v2844_v14 = vsel %vm418_vm10, 1.0, %v3812_v19  ;;  %v515_v17 = vmul.f32 %v2845_v10, %v353_v61  ;;  %v2008_v3 = vld [vmem:[%s4602_s5 + $0x78] sm:$0xff] }
 0x109   :  { %v358_v15 = vadd.f32 %v4200_v39, %v357_v13  ;;  %v514_v16 = vmul.f32 %v2844_v14, %v348_v1  ;;  %v3298_v18 = vpop.f32.mrb[22].mxu1  ;;  %3453 = vmatprep.mubr.f32.mxu1 %v1348_v12  ;;  %v3723_v4 = vpack.c.bf16 %v2008_v3, %v2007_v2 }
 0x10a   :  { %vm421_vm11 = vcmp.gt.f32.partialorder %v363_v11, 0.0  ;;  %v1351_v20 = vmul.f32 %v3298_v18, %v2845_v10  ;;  %v1279_v22 = vpop.f32.mrb[23].mxu1  ;;  %3454 = vmatmul.mubr.f32.gmra.mrb[52].mxu1 %v1349_v7  ;;  %v4329_v7 = vld [vmem:[%s4601_s4] ss:$0 sm:$0xff] }
 0x10b   :  { %v3254_v21 = vpop.f32.mrb[26].mxu0  ;;  %3376 = vmatprep.mubr.f32.mxu0 %v514_v16  ;;  %v2847_v23 = vsel %vm421_vm11, 1.0, %v3812_v19  ;;  %vm420_vm12 = vcmp.gt.f32.partialorder %v358_v15, 0.0  ;;  %v1350_v25 = vmul.f32 %v2844_v14, %v1279_v22  ;;  %3724 = vmatprep.subr.bf16.mxu0 %v3723_v4 }
 0x10c   :  { %v373_v24 = vadd.f32 %v3254_v21, %v4200_v39  ;;  %v367_v26 = vpop.f32.mrb[27].mxu0  ;;  %3377 = vmatmul.mubr.f32.gmra.mrb[54].mxu0 %v515_v17  ;;  %v2846_v5 = vsel %vm420_vm12, 1.0, %v3812_v19  ;;  %v517_v29 = vmul.f32 %v2847_v23, %v363_v11  ;;  %3756 = vmatprep.subr.bf16.mxu1 %v3723_v4 }
 0x10d   :  { %v368_v27 = vadd.f32 %v4200_v39, %v367_v26  ;;  %v516_v28 = vmul.f32 %v2846_v5, %v358_v15  ;;  %v3301_v30 = vpop.f32.mrb[24].mxu1  ;;  %3456 = vmatprep.mubr.f32.mxu1 %v1350_v25  ;;  %3726 = vmatpush3.bf16.msra.mxu0 %v3723_v4 }
 0x10e   :  { %vm423_vm13 = vcmp.gt.f32.partialorder %v373_v24, 0.0  ;;  %v1353_v31 = vmul.f32 %v3301_v30, %v2847_v23  ;;  %v1289_v33 = vpop.f32.mrb[25].mxu1  ;;  %3457 = vmatmul.mubr.f32.gmra.mrb[54].mxu1 %v1351_v20 }
 0x10f   :  { %v3257_v32 = vpop.f32.mrb[28].mxu0  ;;  %3379 = vmatprep.mubr.f32.mxu0 %v516_v28  ;;  %v2849_v34 = vsel %vm423_vm13, 1.0, %v3812_v19  ;;  %vm422_vm14 = vcmp.gt.f32.partialorder %v368_v27, 0.0  ;;  %v1352_v36 = vmul.f32 %v2846_v5, %v1289_v33  ;;  %3758 = vmatpush3.bf16.msra.mxu1 %v3723_v4 }
 0x110   :  { %v383_v35 = vadd.f32 %v3257_v32, %v4200_v39  ;;  %v377_v37 = vpop.f32.mrb[29].mxu0  ;;  %3380 = vmatmul.mubr.f32.gmra.mrb[56].mxu0 %v517_v29  ;;  %v2848_v38 = vsel %vm422_vm14, 1.0, %v3812_v19  ;;  %v519_v42 = vmul.f32 %v2849_v34, %v373_v24 }
 0x111   :  { %v378_v40 = vadd.f32 %v4200_v39, %v377_v37  ;;  %v518_v41 = vmul.f32 %v2848_v38, %v368_v27  ;;  %v3304_v43 = vpop.f32.mrb[26].mxu1  ;;  %3459 = vmatprep.mubr.f32.mxu1 %v1352_v36 }
 0x112   :  { %vm425_vm15 = vcmp.gt.f32.partialorder %v383_v35, 0.0  ;;  %v1355_v44 = vmul.f32 %v3304_v43, %v2849_v34  ;;  %v1299_v46 = vpop.f32.mrb[27].mxu1  ;;  %3460 = vmatmul.mubr.f32.gmra.mrb[56].mxu1 %v1353_v31 }
 0x113   :  { %v3260_v45 = vpop.f32.mrb[30].mxu0  ;;  %3382 = vmatprep.mubr.f32.mxu0 %v518_v41  ;;  %v2851_v47 = vsel %vm425_vm15, 1.0, %v3812_v19  ;;  %vm424_vm0 = vcmp.gt.f32.partialorder %v378_v40, 0.0  ;;  %v1354_v49 = vmul.f32 %v2848_v38, %v1299_v46 }
 0x114   :  { %v393_v48 = vadd.f32 %v3260_v45, %v4200_v39  ;;  %v387_v50 = vpop.f32.mrb[31].mxu0  ;;  %3383 = vmatmul.mubr.f32.gmra.mrb[58].mxu0 %v519_v42  ;;  %v2850_v51 = vsel %vm424_vm0, 1.0, %v3812_v19  ;;  %v521_v54 = vmul.f32 %v2851_v47, %v383_v35 }
 0x115   :  { %v388_v52 = vadd.f32 %v4200_v39, %v387_v50  ;;  %v520_v53 = vmul.f32 %v2850_v51, %v378_v40  ;;  %v3307_v55 = vpop.f32.mrb[28].mxu1  ;;  %3462 = vmatprep.mubr.f32.mxu1 %v1354_v49 }
 0x116   :  { %vm427_vm2 = vcmp.gt.f32.partialorder %v393_v48, 0.0  ;;  %v1357_v56 = vmul.f32 %v3307_v55, %v2851_v47  ;;  %v1309_v57 = vpop.f32.mrb[29].mxu1  ;;  %3463 = vmatmul.mubr.f32.gmra.mrb[58].mxu1 %v1355_v44 }
 0x117   :  { %3385 = vmatprep.mubr.f32.mxu0 %v520_v53  ;;  %v2853_v58 = vsel %vm427_vm2, 1.0, %v3812_v19  ;;  %vm426_vm3 = vcmp.gt.f32.partialorder %v388_v52, 0.0  ;;  %v1356_v59 = vmul.f32 %v2850_v51, %v1309_v57 }
 0x118   :  { %3386 = vmatmul.mubr.f32.gmra.mrb[60].mxu0 %v521_v54  ;;  %v2852_v60 = vsel %vm426_vm3, 1.0, %v3812_v19  ;;  %v523_v62 = vmul.f32 %v2853_v58, %v393_v48 }
 0x119   :  { %v522_v61 = vmul.f32 %v2852_v60, %v388_v52  ;;  %v3310_v63 = vpop.f32.mrb[30].mxu1  ;;  %3465 = vmatprep.mubr.f32.mxu1 %v1356_v59 }
 0x11a   :  { %v1359_v39 = vmul.f32 %v3310_v63, %v2853_v58  ;;  %v1319_v0 = vpop.f32.mrb[31].mxu1  ;;  %3466 = vmatmul.mubr.f32.gmra.mrb[60].mxu1 %v1357_v56 }
 0x11b   :  { %3388 = vmatprep.mubr.f32.mxu0 %v522_v61  ;;  %v1358_v1 = vmul.f32 %v2852_v60, %v1319_v0 }
 0x11c   :  { %3389 = vmatmul.mubr.f32.gmra.mrb[62].mxu0 %v523_v62 }
 0x11d   :  { %3468 = vmatprep.mubr.f32.mxu1 %v1358_v1 }
 0x11e   :  { %3469 = vmatmul.mubr.f32.gmra.mrb[62].mxu1 %v1359_v39 }
 0x1b3   :  { %v3345_v8 = vpop.f32.mrb[32].mxu0 }
 0x1b4   :  { %v1455_v9 = vadd.f32 %v3345_v8, %v4329_v7  ;;  %v1449_v10 = vpop.f32.mrb[33].mxu0 }
 0x1b5   :  { %v1450_v11 = vadd.f32 %v4329_v7, %v1449_v10  ;;  %v3425_v12 = vpop.f32.mrb[32].mxu1 }
 0x1b6   :  { %vm1609_vm1 = vcmp.gt.f32.partialorder %v1455_v9, 0.0  ;;  %v1770_v15 = vpop.f32.mrb[33].mxu1 }
 0x1b7   :  { %v2889_v13 = vsel %vm1609_vm1, 1.0, %v3812_v19  ;;  %v3348_v14 = vpop.f32.mrb[34].mxu0  ;;  %vm1608_vm4 = vcmp.gt.f32.partialorder %v1450_v11, 0.0 }
 0x1b8   :  { %v1930_v16 = vmul.f32 %v3425_v12, %v2889_v13  ;;  %v1465_v17 = vadd.f32 %v3348_v14, %v4329_v7  ;;  %v2888_v18 = vsel %vm1608_vm4, 1.0, %v3812_v19  ;;  %v1459_v20 = vpop.f32.mrb[35].mxu0  ;;  %v1962_v24 = vmul.f32 %v2889_v13, %v1455_v9 }
 0x1b9   :  { %v1929_v21 = vmul.f32 %v2888_v18, %v1770_v15  ;;  %v1961_v22 = vmul.f32 %v2888_v18, %v1450_v11  ;;  %v1460_v23 = vadd.f32 %v4329_v7, %v1459_v20  ;;  %v3428_v25 = vpop.f32.mrb[34].mxu1 }
 0x1ba   :  { %vm1611_vm5 = vcmp.gt.f32.partialorder %v1465_v17, 0.0  ;;  %v1780_v27 = vpop.f32.mrb[35].mxu1 }
 0x1bb   :  { %v2891_v26 = vsel %vm1611_vm5, 1.0, %v3812_v19  ;;  %v3351_v5 = vpop.f32.mrb[36].mxu0  ;;  %vm1610_vm6 = vcmp.gt.f32.partialorder %v1460_v23, 0.0  ;;  %3503 = vmatprep.mubr.f32.mxu0 %v1961_v22  ;;  %3583 = vmatprep.mubr.f32.mxu1 %v1929_v21 }
 0x1bc   :  { %v1932_v28 = vmul.f32 %v3428_v25, %v2891_v26  ;;  %v1475_v29 = vadd.f32 %v3351_v5, %v4329_v7  ;;  %v2890_v30 = vsel %vm1610_vm6, 1.0, %v3812_v19  ;;  %v1469_v31 = vpop.f32.mrb[37].mxu0  ;;  %3504 = vmatmul.mubr.f32.vlgmr.msra.gmra.mrb[64].mxu0 %v1962_v24  ;;  %3584 = vmatmul.mubr.f32.vlgmr.msra.gmra.mrb[64].mxu1 %v1930_v16  ;;  %v1964_v35 = vmul.f32 %v2891_v26, %v1465_v17 }
 0x1bd   :  { %v1931_v32 = vmul.f32 %v2890_v30, %v1780_v27  ;;  %v1963_v33 = vmul.f32 %v2890_v30, %v1460_v23  ;;  %v1470_v34 = vadd.f32 %v4329_v7, %v1469_v31  ;;  %v3431_v36 = vpop.f32.mrb[36].mxu1 }
 0x1be   :  { %vm1613_vm7 = vcmp.gt.f32.partialorder %v1475_v29, 0.0  ;;  %v1790_v40 = vpop.f32.mrb[37].mxu1 }
 0x1bf   :  { %v2893_v37 = vsel %vm1613_vm7, 1.0, %v3812_v19  ;;  %v3354_v38 = vpop.f32.mrb[38].mxu0  ;;  %vm1612_vm8 = vcmp.gt.f32.partialorder %v1470_v34, 0.0  ;;  %3506 = vmatprep.mubr.f32.mxu0 %v1963_v33  ;;  %3586 = vmatprep.mubr.f32.mxu1 %v1931_v32 }
 0x1c0   :  { %v1934_v41 = vmul.f32 %v3431_v36, %v2893_v37  ;;  %v1485_v42 = vadd.f32 %v3354_v38, %v4329_v7  ;;  %v2892_v43 = vsel %vm1612_vm8, 1.0, %v3812_v19  ;;  %v1479_v44 = vpop.f32.mrb[39].mxu0  ;;  %3507 = vmatmul.mubr.f32.gmra.mrb[66].mxu0 %v1964_v35  ;;  %3587 = vmatmul.mubr.f32.gmra.mrb[66].mxu1 %v1932_v28  ;;  %v1966_v48 = vmul.f32 %v2893_v37, %v1475_v29 }
 0x1c1   :  { %v1933_v45 = vmul.f32 %v2892_v43, %v1790_v40  ;;  %v1965_v46 = vmul.f32 %v2892_v43, %v1470_v34  ;;  %v1480_v47 = vadd.f32 %v4329_v7, %v1479_v44  ;;  %v3434_v49 = vpop.f32.mrb[38].mxu1 }
 0x1c2   :  { %vm1615_vm9 = vcmp.gt.f32.partialorder %v1485_v42, 0.0  ;;  %v1800_v52 = vpop.f32.mrb[39].mxu1 }
 0x1c3   :  { %v2895_v50 = vsel %vm1615_vm9, 1.0, %v3812_v19  ;;  %v3357_v51 = vpop.f32.mrb[40].mxu0  ;;  %vm1614_vm10 = vcmp.gt.f32.partialorder %v1480_v47, 0.0  ;;  %3509 = vmatprep.mubr.f32.mxu0 %v1965_v46  ;;  %3589 = vmatprep.mubr.f32.mxu1 %v1933_v45 }
 0x1c4   :  { %v1936_v53 = vmul.f32 %v3434_v49, %v2895_v50  ;;  %v1495_v54 = vadd.f32 %v3357_v51, %v4329_v7  ;;  %v2894_v55 = vsel %vm1614_vm10, 1.0, %v3812_v19  ;;  %v1489_v56 = vpop.f32.mrb[41].mxu0  ;;  %3510 = vmatmul.mubr.f32.gmra.mrb[68].mxu0 %v1966_v48  ;;  %3590 = vmatmul.mubr.f32.gmra.mrb[68].mxu1 %v1934_v41  ;;  %v1968_v60 = vmul.f32 %v2895_v50, %v1485_v42 }
 0x1c5   :  { %v1935_v57 = vmul.f32 %v2894_v55, %v1800_v52  ;;  %v1967_v58 = vmul.f32 %v2894_v55, %v1480_v47  ;;  %v1490_v59 = vadd.f32 %v4329_v7, %v1489_v56  ;;  %v3437_v61 = vpop.f32.mrb[40].mxu1 }
 0x1c6   :  { %vm1617_vm11 = vcmp.gt.f32.partialorder %v1495_v54, 0.0  ;;  %v1810_v39 = vpop.f32.mrb[41].mxu1 }
 0x1c7   :  { %v2897_v62 = vsel %vm1617_vm11, 1.0, %v3812_v19  ;;  %v3360_v63 = vpop.f32.mrb[42].mxu0  ;;  %vm1616_vm12 = vcmp.gt.f32.partialorder %v1490_v59, 0.0  ;;  %3512 = vmatprep.mubr.f32.mxu0 %v1967_v58  ;;  %3592 = vmatprep.mubr.f32.mxu1 %v1935_v57 }
 0x1c8   :  { %v1938_v0 = vmul.f32 %v3437_v61, %v2897_v62  ;;  %v1505_v1 = vadd.f32 %v3360_v63, %v4329_v7  ;;  %v2896_v2 = vsel %vm1616_vm12, 1.0, %v3812_v19  ;;  %v1499_v3 = vpop.f32.mrb[43].mxu0  ;;  %3513 = vmatmul.mubr.f32.gmra.mrb[70].mxu0 %v1968_v60  ;;  %3593 = vmatmul.mubr.f32.gmra.mrb[70].mxu1 %v1936_v53  ;;  %v1970_v10 = vmul.f32 %v2897_v62, %v1495_v54 }
 0x1c9   :  { %v1937_v4 = vmul.f32 %v2896_v2, %v1810_v39  ;;  %v1969_v8 = vmul.f32 %v2896_v2, %v1490_v59  ;;  %v1500_v9 = vadd.f32 %v4329_v7, %v1499_v3  ;;  %v3440_v11 = vpop.f32.mrb[42].mxu1 }
 0x1ca   :  { %vm1619_vm13 = vcmp.gt.f32.partialorder %v1505_v1, 0.0  ;;  %v1820_v14 = vpop.f32.mrb[43].mxu1 }
 0x1cb   :  { %v2899_v12 = vsel %vm1619_vm13, 1.0, %v3812_v19  ;;  %v3363_v13 = vpop.f32.mrb[44].mxu0  ;;  %vm1618_vm14 = vcmp.gt.f32.partialorder %v1500_v9, 0.0  ;;  %3515 = vmatprep.mubr.f32.mxu0 %v1969_v8  ;;  %3595 = vmatprep.mubr.f32.mxu1 %v1937_v4 }
 0x1cc   :  { %v1940_v15 = vmul.f32 %v3440_v11, %v2899_v12  ;;  %v1515_v16 = vadd.f32 %v3363_v13, %v4329_v7  ;;  %v2898_v17 = vsel %vm1618_vm14, 1.0, %v3812_v19  ;;  %v1509_v18 = vpop.f32.mrb[45].mxu0  ;;  %3516 = vmatmul.mubr.f32.gmra.mrb[72].mxu0 %v1970_v10  ;;  %3596 = vmatmul.mubr.f32.gmra.mrb[72].mxu1 %v1938_v0  ;;  %v1972_v23 = vmul.f32 %v2899_v12, %v1505_v1 }
 0x1cd   :  { %v1939_v20 = vmul.f32 %v2898_v17, %v1820_v14  ;;  %v1971_v21 = vmul.f32 %v2898_v17, %v1500_v9  ;;  %v1510_v22 = vadd.f32 %v4329_v7, %v1509_v18  ;;  %v3443_v24 = vpop.f32.mrb[44].mxu1 }
 0x1ce   :  { %vm1621_vm15 = vcmp.gt.f32.partialorder %v1515_v16, 0.0  ;;  %v1830_v5 = vpop.f32.mrb[45].mxu1 }
 0x1cf   :  { %v2901_v25 = vsel %vm1621_vm15, 1.0, %v3812_v19  ;;  %v3366_v26 = vpop.f32.mrb[46].mxu0  ;;  %vm1620_vm0 = vcmp.gt.f32.partialorder %v1510_v22, 0.0  ;;  %3518 = vmatprep.mubr.f32.mxu0 %v1971_v21  ;;  %3598 = vmatprep.mubr.f32.mxu1 %v1939_v20 }
 0x1d0   :  { %v1942_v27 = vmul.f32 %v3443_v24, %v2901_v25  ;;  %v1525_v28 = vadd.f32 %v3366_v26, %v4329_v7  ;;  %v2900_v29 = vsel %vm1620_vm0, 1.0, %v3812_v19  ;;  %v1519_v30 = vpop.f32.mrb[47].mxu0  ;;  %3519 = vmatmul.mubr.f32.gmra.mrb[74].mxu0 %v1972_v23  ;;  %3599 = vmatmul.mubr.f32.gmra.mrb[74].mxu1 %v1940_v15  ;;  %v1974_v34 = vmul.f32 %v2901_v25, %v1515_v16 }
 0x1d1   :  { %v1941_v31 = vmul.f32 %v2900_v29, %v1830_v5  ;;  %v1973_v32 = vmul.f32 %v2900_v29, %v1510_v22  ;;  %v1520_v33 = vadd.f32 %v4329_v7, %v1519_v30  ;;  %v3446_v35 = vpop.f32.mrb[46].mxu1 }
 0x1d2   :  { %vm1623_vm2 = vcmp.gt.f32.partialorder %v1525_v28, 0.0  ;;  %v1840_v38 = vpop.f32.mrb[47].mxu1 }
 0x1d3   :  { %v2903_v36 = vsel %vm1623_vm2, 1.0, %v3812_v19  ;;  %v3369_v37 = vpop.f32.mrb[48].mxu0  ;;  %vm1622_vm3 = vcmp.gt.f32.partialorder %v1520_v33, 0.0  ;;  %3521 = vmatprep.mubr.f32.mxu0 %v1973_v32  ;;  %3601 = vmatprep.mubr.f32.mxu1 %v1941_v31 }
 0x1d4   :  { %v1944_v40 = vmul.f32 %v3446_v35, %v2903_v36  ;;  %v1535_v41 = vadd.f32 %v3369_v37, %v4329_v7  ;;  %v2902_v42 = vsel %vm1622_vm3, 1.0, %v3812_v19  ;;  %v1529_v43 = vpop.f32.mrb[49].mxu0  ;;  %3522 = vmatmul.mubr.f32.gmra.mrb[76].mxu0 %v1974_v34  ;;  %3602 = vmatmul.mubr.f32.gmra.mrb[76].mxu1 %v1942_v27  ;;  %v1976_v47 = vmul.f32 %v2903_v36, %v1525_v28 }
 0x1d5   :  { %v1943_v44 = vmul.f32 %v2902_v42, %v1840_v38  ;;  %v1975_v45 = vmul.f32 %v2902_v42, %v1520_v33  ;;  %v1530_v46 = vadd.f32 %v4329_v7, %v1529_v43  ;;  %v3449_v48 = vpop.f32.mrb[48].mxu1 }
 0x1d6   :  { %vm1625_vm1 = vcmp.gt.f32.partialorder %v1535_v41, 0.0  ;;  %v1850_v51 = vpop.f32.mrb[49].mxu1 }
 0x1d7   :  { %v2905_v49 = vsel %vm1625_vm1, 1.0, %v3812_v19  ;;  %v3372_v50 = vpop.f32.mrb[50].mxu0  ;;  %vm1624_vm4 = vcmp.gt.f32.partialorder %v1530_v46, 0.0  ;;  %3524 = vmatprep.mubr.f32.mxu0 %v1975_v45  ;;  %3604 = vmatprep.mubr.f32.mxu1 %v1943_v44  ;;  %vm2466_vm1 = vcmp.lt.s32.totalorder %v3877_v6, 4 }
 0x1d8   :  { %v1946_v52 = vmul.f32 %v3449_v48, %v2905_v49  ;;  %v1545_v53 = vadd.f32 %v3372_v50, %v4329_v7  ;;  %v2904_v54 = vsel %vm1624_vm4, 1.0, %v3812_v19  ;;  %v1539_v55 = vpop.f32.mrb[51].mxu0  ;;  %3525 = vmatmul.mubr.f32.gmra.mrb[78].mxu0 %v1976_v47  ;;  %3605 = vmatmul.mubr.f32.gmra.mrb[78].mxu1 %v1944_v40  ;;  %v1978_v59 = vmul.f32 %v2905_v49, %v1535_v41 }
 0x1d9   :  { %v1945_v56 = vmul.f32 %v2904_v54, %v1850_v51  ;;  %v1977_v57 = vmul.f32 %v2904_v54, %v1530_v46  ;;  %v1540_v58 = vadd.f32 %v4329_v7, %v1539_v55  ;;  %v3452_v60 = vpop.f32.mrb[50].mxu1 }
 0x1da   :  { %vm1627_vm5 = vcmp.gt.f32.partialorder %v1545_v53, 0.0  ;;  %v1860_v63 = vpop.f32.mrb[51].mxu1 }
 0x1db   :  { %v2907_v61 = vsel %vm1627_vm5, 1.0, %v3812_v19  ;;  %v3375_v62 = vpop.f32.mrb[52].mxu0  ;;  %vm1626_vm6 = vcmp.gt.f32.partialorder %v1540_v58, 0.0  ;;  %3527 = vmatprep.mubr.f32.mxu0 %v1977_v57  ;;  %3607 = vmatprep.mubr.f32.mxu1 %v1945_v56 }
 0x1dc   :  { %v1948_v39 = vmul.f32 %v3452_v60, %v2907_v61  ;;  %v1555_v0 = vadd.f32 %v3375_v62, %v4329_v7  ;;  %v2906_v1 = vsel %vm1626_vm6, 1.0, %v3812_v19  ;;  %v1549_v2 = vpop.f32.mrb[53].mxu0  ;;  %3528 = vmatmul.mubr.f32.gmra.mrb[80].mxu0 %v1978_v59  ;;  %3608 = vmatmul.mubr.f32.gmra.mrb[80].mxu1 %v1946_v52  ;;  %v1980_v9 = vmul.f32 %v2907_v61, %v1545_v53 }
 0x1dd   :  { %v1947_v3 = vmul.f32 %v2906_v1, %v1860_v63  ;;  %v1979_v4 = vmul.f32 %v2906_v1, %v1540_v58  ;;  %v1550_v8 = vadd.f32 %v4329_v7, %v1549_v2  ;;  %v3455_v10 = vpop.f32.mrb[52].mxu1 }
 0x1de   :  { %vm1629_vm7 = vcmp.gt.f32.partialorder %v1555_v0, 0.0  ;;  %v1870_v13 = vpop.f32.mrb[53].mxu1 }
 0x1df   :  { %v2909_v11 = vsel %vm1629_vm7, 1.0, %v3812_v19  ;;  %v3378_v12 = vpop.f32.mrb[54].mxu0  ;;  %vm1628_vm8 = vcmp.gt.f32.partialorder %v1550_v8, 0.0  ;;  %3530 = vmatprep.mubr.f32.mxu0 %v1979_v4  ;;  %3610 = vmatprep.mubr.f32.mxu1 %v1947_v3 }
 0x1e0   :  { %v1950_v14 = vmul.f32 %v3455_v10, %v2909_v11  ;;  %v1565_v15 = vadd.f32 %v3378_v12, %v4329_v7  ;;  %v2908_v16 = vsel %vm1628_vm8, 1.0, %v3812_v19  ;;  %v1559_v17 = vpop.f32.mrb[55].mxu0  ;;  %3531 = vmatmul.mubr.f32.gmra.mrb[82].mxu0 %v1980_v9  ;;  %3611 = vmatmul.mubr.f32.gmra.mrb[82].mxu1 %v1948_v39  ;;  %v1982_v22 = vmul.f32 %v2909_v11, %v1555_v0 }
 0x1e1   :  { %v1949_v18 = vmul.f32 %v2908_v16, %v1870_v13  ;;  %v1981_v20 = vmul.f32 %v2908_v16, %v1550_v8  ;;  %v1560_v21 = vadd.f32 %v4329_v7, %v1559_v17  ;;  %v3458_v23 = vpop.f32.mrb[54].mxu1 }
 0x1e2   :  { %vm1631_vm9 = vcmp.gt.f32.partialorder %v1565_v15, 0.0  ;;  %v1880_v26 = vpop.f32.mrb[55].mxu1 }
 0x1e3   :  { %v2911_v24 = vsel %vm1631_vm9, 1.0, %v3812_v19  ;;  %v3381_v25 = vpop.f32.mrb[56].mxu0  ;;  %vm1630_vm10 = vcmp.gt.f32.partialorder %v1560_v21, 0.0  ;;  %3533 = vmatprep.mubr.f32.mxu0 %v1981_v20  ;;  %3613 = vmatprep.mubr.f32.mxu1 %v1949_v18 }
 0x1e4   :  { %v1952_v5 = vmul.f32 %v3458_v23, %v2911_v24  ;;  %v1575_v27 = vadd.f32 %v3381_v25, %v4329_v7  ;;  %v2910_v28 = vsel %vm1630_vm10, 1.0, %v3812_v19  ;;  %v1569_v29 = vpop.f32.mrb[57].mxu0  ;;  %3534 = vmatmul.mubr.f32.gmra.mrb[84].mxu0 %v1982_v22  ;;  %3614 = vmatmul.mubr.f32.gmra.mrb[84].mxu1 %v1950_v14  ;;  %v1984_v33 = vmul.f32 %v2911_v24, %v1565_v15 }
 0x1e5   :  { %v1951_v30 = vmul.f32 %v2910_v28, %v1880_v26  ;;  %v1983_v31 = vmul.f32 %v2910_v28, %v1560_v21  ;;  %v1570_v32 = vadd.f32 %v4329_v7, %v1569_v29  ;;  %v3461_v34 = vpop.f32.mrb[56].mxu1 }
 0x1e6   :  { %vm1633_vm11 = vcmp.gt.f32.partialorder %v1575_v27, 0.0  ;;  %v1890_v37 = vpop.f32.mrb[57].mxu1 }
 0x1e7   :  { %v2913_v35 = vsel %vm1633_vm11, 1.0, %v3812_v19  ;;  %v3384_v36 = vpop.f32.mrb[58].mxu0  ;;  %vm1632_vm12 = vcmp.gt.f32.partialorder %v1570_v32, 0.0  ;;  %3536 = vmatprep.mubr.f32.mxu0 %v1983_v31  ;;  %3616 = vmatprep.mubr.f32.mxu1 %v1951_v30 }
 0x1e8   :  { %v1954_v38 = vmul.f32 %v3461_v34, %v2913_v35  ;;  %v1585_v40 = vadd.f32 %v3384_v36, %v4329_v7  ;;  %v2912_v41 = vsel %vm1632_vm12, 1.0, %v3812_v19  ;;  %v1579_v42 = vpop.f32.mrb[59].mxu0  ;;  %3537 = vmatmul.mubr.f32.gmra.mrb[86].mxu0 %v1984_v33  ;;  %3617 = vmatmul.mubr.f32.gmra.mrb[86].mxu1 %v1952_v5  ;;  %v1986_v46 = vmul.f32 %v2913_v35, %v1575_v27 }
 0x1e9   :  { %v1953_v43 = vmul.f32 %v2912_v41, %v1890_v37  ;;  %v1985_v44 = vmul.f32 %v2912_v41, %v1570_v32  ;;  %v1580_v45 = vadd.f32 %v4329_v7, %v1579_v42  ;;  %v3464_v47 = vpop.f32.mrb[58].mxu1  ;;  %v4409_v27 = vsel %vm2466_vm1, 1e-05, %v3812_v19 }
 0x1ea   :  { %vm1635_vm13 = vcmp.gt.f32.partialorder %v1585_v40, 0.0  ;;  %v1900_v50 = vpop.f32.mrb[59].mxu1 }
 0x1eb   :  { %v2915_v48 = vsel %vm1635_vm13, 1.0, %v3812_v19  ;;  %v3387_v49 = vpop.f32.mrb[60].mxu0  ;;  %vm1634_vm14 = vcmp.gt.f32.partialorder %v1580_v45, 0.0  ;;  %3539 = vmatprep.mubr.f32.mxu0 %v1985_v44  ;;  %3619 = vmatprep.mubr.f32.mxu1 %v1953_v43 }
 0x1ec   :  { %v1956_v51 = vmul.f32 %v3464_v47, %v2915_v48  ;;  %v1595_v52 = vadd.f32 %v3387_v49, %v4329_v7  ;;  %v2914_v53 = vsel %vm1634_vm14, 1.0, %v3812_v19  ;;  %v1589_v54 = vpop.f32.mrb[61].mxu0  ;;  %3540 = vmatmul.mubr.f32.gmra.mrb[88].mxu0 %v1986_v46  ;;  %3620 = vmatmul.mubr.f32.gmra.mrb[88].mxu1 %v1954_v38  ;;  %v1988_v58 = vmul.f32 %v2915_v48, %v1585_v40 }
 0x1ed   :  { %v1955_v55 = vmul.f32 %v2914_v53, %v1900_v50  ;;  %v1987_v56 = vmul.f32 %v2914_v53, %v1580_v45  ;;  %v1590_v57 = vadd.f32 %v4329_v7, %v1589_v54  ;;  %v3467_v59 = vpop.f32.mrb[60].mxu1 }
 0x1ee   :  { %vm1637_vm15 = vcmp.gt.f32.partialorder %v1595_v52, 0.0  ;;  %v1910_v62 = vpop.f32.mrb[61].mxu1 }
 0x1ef   :  { %v2917_v60 = vsel %vm1637_vm15, 1.0, %v3812_v19  ;;  %v3390_v61 = vpop.f32.mrb[62].mxu0  ;;  %vm1636_vm0 = vcmp.gt.f32.partialorder %v1590_v57, 0.0  ;;  %3542 = vmatprep.mubr.f32.mxu0 %v1987_v56  ;;  %3622 = vmatprep.mubr.f32.mxu1 %v1955_v55 }
 0x1f0   :  { %v1958_v63 = vmul.f32 %v3467_v59, %v2917_v60  ;;  %v1605_v39 = vadd.f32 %v3390_v61, %v4329_v7  ;;  %v2916_v0 = vsel %vm1636_vm0, 1.0, %v3812_v19  ;;  %v1599_v1 = vpop.f32.mrb[63].mxu0  ;;  %3543 = vmatmul.mubr.f32.gmra.mrb[90].mxu0 %v1988_v58  ;;  %3623 = vmatmul.mubr.f32.gmra.mrb[90].mxu1 %v1956_v51  ;;  %v1990_v8 = vmul.f32 %v2917_v60, %v1595_v52 }
 0x1f1   :  { %v1957_v2 = vmul.f32 %v2916_v0, %v1910_v62  ;;  %v1989_v3 = vmul.f32 %v2916_v0, %v1590_v57  ;;  %v1600_v4 = vadd.f32 %v4329_v7, %v1599_v1  ;;  %v3470_v9 = vpop.f32.mrb[62].mxu1  ;;  %v4398_v7 = vld [vmem:[%s4603_s6] ss:$0 sm:$0xff]  ;;  %s3813_s6 = smov [#allocation4]  }
 0x1f2   :  { %vm1639_vm2 = vcmp.gt.f32.partialorder %v1605_v39, 0.0  ;;  %v1920_v11 = vpop.f32.mrb[63].mxu1  ;;  %s2773_s2 = sshll.u32 %s3813_s6, 4  ;;  %s2774_s2 = int_to_ptr.vmem [resolvable:$true] %s2773_s2 }
 0x1f3   :  { %v2919_v10 = vsel %vm1639_vm2, 1.0, %v3812_v19  ;;  %vm1638_vm3 = vcmp.gt.f32.partialorder %v1600_v4, 0.0  ;;  %3545 = vmatprep.mubr.f32.mxu0 %v1989_v3  ;;  %3625 = vmatprep.mubr.f32.mxu1 %v1957_v2  ;;  %s3764_s20 = scalar_lea.vmem %s2774_s2, 4096  ;;  %p3769_p1 = scmp.lt.s32.totalorder %s2774_s2, %s2774_s2 }
 0x1f4   :  { %v1960_v12 = vmul.f32 %v3470_v9, %v2919_v10  ;;  %v2918_v13 = vsel %vm1638_vm3, 1.0, %v3812_v19  ;;  %3546 = vmatmul.mubr.f32.gmra.mrb[92].mxu0 %v1990_v8  ;;  %3626 = vmatmul.mubr.f32.gmra.mrb[92].mxu1 %v1958_v63  ;;  %v1992_v16 = vmul.f32 %v2919_v10, %v1605_v39  ;;  %p3765_p0 = scmp.ne.s32.totalorder %s2774_s2, %s3764_s20  ;;  %p3770_p2 = scmp.lt.s32.totalorder %s3764_s20, %s3764_s20 }
 0x1f5   :  { %v1959_v14 = vmul.f32 %v2918_v13, %v1920_v11  ;;  %v1991_v15 = vmul.f32 %v2918_v13, %v1600_v4 }
 0x1f6   :  { %p3771_p3 = por %p3770_p2, %p3769_p1 }
 0x1f7   :  { %3548 = vmatprep.mubr.f32.mxu0 %v1991_v15  ;;  %3628 = vmatprep.mubr.f32.mxu1 %v1959_v14 }
 0x1f8   :  { %3549 = vmatmul.mubr.f32.gmra.mrb[94].mxu0 %v1992_v16  ;;  %3629 = vmatmul.mubr.f32.gmra.mrb[94].mxu1 %v1960_v12  ;;  %p3772_p4 = pnand %p3771_p3, %p3765_p0 }
 0x28f   :  { %v3505_v17 = vpop.f32.mrb[64].mxu0  ;;  %v3585_v18 = vpop.f32.mrb[64].mxu1 }
 0x290   :  { %v2088_v20 = vadd.f32 %v3505_v17, %v4398_v7  ;;  %v2082_v21 = vpop.f32.mrb[65].mxu0  ;;  %v2307_v22 = vpop.f32.mrb[65].mxu1 }
 0x291   :  { %v2083_v23 = vadd.f32 %v4398_v7, %v2082_v21 }
 0x292   :  { %vm2468_vm4 = vcmp.gt.f32.partialorder %v2088_v20, 0.0 }
 0x293   :  { %v2922_v24 = vsel %vm2468_vm4, 1.0, %v3812_v19  ;;  %vm2467_vm5 = vcmp.gt.f32.partialorder %v2083_v23, 0.0  ;;  %v3508_v25 = vpop.f32.mrb[66].mxu0  ;;  %v3588_v26 = vpop.f32.mrb[66].mxu1 }
 0x294   :  { %v2564_v5 = vsel %vm2466_vm1, %v2922_v24, 1.0  ;;  %v2921_v28 = vsel %vm2467_vm5, 1.0, %v3812_v19  ;;  %v2098_v29 = vadd.f32 %v3508_v25, %v4398_v7  ;;  %v2092_v30 = vpop.f32.mrb[67].mxu0  ;;  %v2317_v31 = vpop.f32.mrb[67].mxu1 }
 0x295   :  { %v2596_v32 = vmul.f32 %v2564_v5, %v2088_v20  ;;  %v2693_v33 = vmul.f32 %v3585_v18, %v2564_v5  ;;  %v2563_v34 = vsel %vm2466_vm1, %v2921_v28, 1.0  ;;  %v2093_v35 = vadd.f32 %v4398_v7, %v2092_v30 }
 0x296   :  { %v2595_v36 = vmul.f32 %v2563_v34, %v2083_v23  ;;  %v2692_v37 = vmul.f32 %v2563_v34, %v2307_v22  ;;  %vm2470_vm6 = vcmp.gt.f32.partialorder %v2098_v29, 0.0 }
 0x297   :  { %v2629_v38 = vadd.f32 %v4409_v27, %v2596_v32  ;;  %2725 = vst [vmem:[#allocation4 + $0x8] sm:$0xff] %v2693_v33  ;;  %v2924_v40 = vsel %vm2470_vm6, 1.0, %v3812_v19  ;;  %vm2469_vm7 = vcmp.gt.f32.partialorder %v2093_v35, 0.0  ;;  %v3511_v41 = vpop.f32.mrb[68].mxu0  ;;  %v3591_v42 = vpop.f32.mrb[68].mxu1 }
 0x298   :  { %v2628_v43 = vadd.f32 %v4409_v27, %v2595_v36  ;;  %2724 = vst [vmem:[#allocation4] sm:$0xff] %v2692_v37  ;;  %v2566_v44 = vsel %vm2466_vm1, %v2924_v40, 1.0  ;;  %v2923_v45 = vsel %vm2469_vm7, 1.0, %v3812_v19  ;;  %v2108_v46 = vadd.f32 %v3511_v41, %v4398_v7  ;;  %v2102_v47 = vpop.f32.mrb[69].mxu0  ;;  %v2327_v48 = vpop.f32.mrb[69].mxu1 }
 0x299   :  { %2661 = vst [vmem:[#allocation2 + $0x8] sm:$0xff] %v2629_v38  ;;  %v2598_v49 = vmul.f32 %v2566_v44, %v2098_v29  ;;  %v2695_v50 = vmul.f32 %v3588_v26, %v2566_v44  ;;  %v2565_v51 = vsel %vm2466_vm1, %v2923_v45, 1.0  ;;  %v2103_v52 = vadd.f32 %v4398_v7, %v2102_v47 }
 0x29a   :  { %2660 = vst [vmem:[#allocation2] sm:$0xff] %v2628_v43  ;;  %v2597_v53 = vmul.f32 %v2565_v51, %v2093_v35  ;;  %v2694_v54 = vmul.f32 %v2565_v51, %v2317_v31  ;;  %vm2472_vm8 = vcmp.gt.f32.partialorder %v2108_v46, 0.0 }
 0x29b   :  { %v2631_v55 = vadd.f32 %v4409_v27, %v2598_v49  ;;  %2727 = vst [vmem:[#allocation4 + $0x18] sm:$0xff] %v2695_v50  ;;  %v2926_v56 = vsel %vm2472_vm8, 1.0, %v3812_v19  ;;  %vm2471_vm9 = vcmp.gt.f32.partialorder %v2103_v52, 0.0  ;;  %v3514_v57 = vpop.f32.mrb[70].mxu0  ;;  %v3594_v58 = vpop.f32.mrb[70].mxu1 }
 0x29c   :  { %v2630_v59 = vadd.f32 %v4409_v27, %v2597_v53  ;;  %2726 = vst [vmem:[#allocation4 + $0x10] sm:$0xff] %v2694_v54  ;;  %v2568_v60 = vsel %vm2466_vm1, %v2926_v56, 1.0  ;;  %v2925_v61 = vsel %vm2471_vm9, 1.0, %v3812_v19  ;;  %v2118_v62 = vadd.f32 %v3514_v57, %v4398_v7  ;;  %v2112_v63 = vpop.f32.mrb[71].mxu0  ;;  %v2337_v39 = vpop.f32.mrb[71].mxu1 }
 0x29d   :  { %2663 = vst [vmem:[#allocation2 + $0x18] sm:$0xff] %v2631_v55  ;;  %v2600_v0 = vmul.f32 %v2568_v60, %v2108_v46  ;;  %v2697_v1 = vmul.f32 %v3591_v42, %v2568_v60  ;;  %v2567_v2 = vsel %vm2466_vm1, %v2925_v61, 1.0  ;;  %v2113_v3 = vadd.f32 %v4398_v7, %v2112_v63 }
 0x29e   :  { %2662 = vst [vmem:[#allocation2 + $0x10] sm:$0xff] %v2630_v59  ;;  %v2599_v4 = vmul.f32 %v2567_v2, %v2103_v52  ;;  %v2696_v8 = vmul.f32 %v2567_v2, %v2327_v48  ;;  %vm2474_vm10 = vcmp.gt.f32.partialorder %v2118_v62, 0.0 }
 0x29f   :  { %v2633_v9 = vadd.f32 %v4409_v27, %v2600_v0  ;;  %2729 = vst [vmem:[#allocation4 + $0x28] sm:$0xff] %v2697_v1  ;;  %v2928_v10 = vsel %vm2474_vm10, 1.0, %v3812_v19  ;;  %vm2473_vm11 = vcmp.gt.f32.partialorder %v2113_v3, 0.0  ;;  %v3517_v11 = vpop.f32.mrb[72].mxu0  ;;  %v3597_v12 = vpop.f32.mrb[72].mxu1 }
 0x2a0   :  { %v2632_v13 = vadd.f32 %v4409_v27, %v2599_v4  ;;  %2728 = vst [vmem:[#allocation4 + $0x20] sm:$0xff] %v2696_v8  ;;  %v2570_v14 = vsel %vm2466_vm1, %v2928_v10, 1.0  ;;  %v2927_v15 = vsel %vm2473_vm11, 1.0, %v3812_v19  ;;  %v2128_v16 = vadd.f32 %v3517_v11, %v4398_v7  ;;  %v2122_v17 = vpop.f32.mrb[73].mxu0  ;;  %v2347_v18 = vpop.f32.mrb[73].mxu1 }
 0x2a1   :  { %2665 = vst [vmem:[#allocation2 + $0x28] sm:$0xff] %v2633_v9  ;;  %v2602_v20 = vmul.f32 %v2570_v14, %v2118_v62  ;;  %v2699_v21 = vmul.f32 %v3594_v58, %v2570_v14  ;;  %v2569_v22 = vsel %vm2466_vm1, %v2927_v15, 1.0  ;;  %v2123_v23 = vadd.f32 %v4398_v7, %v2122_v17 }
 0x2a2   :  { %2664 = vst [vmem:[#allocation2 + $0x20] sm:$0xff] %v2632_v13  ;;  %v2601_v24 = vmul.f32 %v2569_v22, %v2113_v3  ;;  %v2698_v25 = vmul.f32 %v2569_v22, %v2337_v39  ;;  %vm2476_vm12 = vcmp.gt.f32.partialorder %v2128_v16, 0.0 }
 0x2a3   :  { %v2635_v26 = vadd.f32 %v4409_v27, %v2602_v20  ;;  %2731 = vst [vmem:[#allocation4 + $0x38] sm:$0xff] %v2699_v21  ;;  %v2930_v5 = vsel %vm2476_vm12, 1.0, %v3812_v19  ;;  %vm2475_vm13 = vcmp.gt.f32.partialorder %v2123_v23, 0.0  ;;  %v3520_v28 = vpop.f32.mrb[74].mxu0  ;;  %v3600_v29 = vpop.f32.mrb[74].mxu1 }
 0x2a4   :  { %v2634_v30 = vadd.f32 %v4409_v27, %v2601_v24  ;;  %2730 = vst [vmem:[#allocation4 + $0x30] sm:$0xff] %v2698_v25  ;;  %v2572_v31 = vsel %vm2466_vm1, %v2930_v5, 1.0  ;;  %v2929_v32 = vsel %vm2475_vm13, 1.0, %v3812_v19  ;;  %v2138_v33 = vadd.f32 %v3520_v28, %v4398_v7  ;;  %v2132_v34 = vpop.f32.mrb[75].mxu0  ;;  %v2357_v35 = vpop.f32.mrb[75].mxu1 }
 0x2a5   :  { %2667 = vst [vmem:[#allocation2 + $0x38] sm:$0xff] %v2635_v26  ;;  %v2604_v36 = vmul.f32 %v2572_v31, %v2128_v16  ;;  %v2701_v37 = vmul.f32 %v3597_v12, %v2572_v31  ;;  %v2571_v38 = vsel %vm2466_vm1, %v2929_v32, 1.0  ;;  %v2133_v40 = vadd.f32 %v4398_v7, %v2132_v34 }
 0x2a6   :  { %2666 = vst [vmem:[#allocation2 + $0x30] sm:$0xff] %v2634_v30  ;;  %v2603_v41 = vmul.f32 %v2571_v38, %v2123_v23  ;;  %v2700_v42 = vmul.f32 %v2571_v38, %v2347_v18  ;;  %vm2478_vm14 = vcmp.gt.f32.partialorder %v2138_v33, 0.0 }
 0x2a7   :  { %v2637_v43 = vadd.f32 %v4409_v27, %v2604_v36  ;;  %2733 = vst [vmem:[#allocation4 + $0x48] sm:$0xff] %v2701_v37  ;;  %v2932_v44 = vsel %vm2478_vm14, 1.0, %v3812_v19  ;;  %vm2477_vm15 = vcmp.gt.f32.partialorder %v2133_v40, 0.0  ;;  %v3523_v45 = vpop.f32.mrb[76].mxu0  ;;  %v3603_v46 = vpop.f32.mrb[76].mxu1 }
 0x2a8   :  { %v2636_v47 = vadd.f32 %v4409_v27, %v2603_v41  ;;  %2732 = vst [vmem:[#allocation4 + $0x40] sm:$0xff] %v2700_v42  ;;  %v2574_v48 = vsel %vm2466_vm1, %v2932_v44, 1.0  ;;  %v2931_v49 = vsel %vm2477_vm15, 1.0, %v3812_v19  ;;  %v2148_v50 = vadd.f32 %v3523_v45, %v4398_v7  ;;  %v2142_v51 = vpop.f32.mrb[77].mxu0  ;;  %v2367_v52 = vpop.f32.mrb[77].mxu1 }
 0x2a9   :  { %2669 = vst [vmem:[#allocation2 + $0x48] sm:$0xff] %v2637_v43  ;;  %v2606_v53 = vmul.f32 %v2574_v48, %v2138_v33  ;;  %v2703_v54 = vmul.f32 %v3600_v29, %v2574_v48  ;;  %v2573_v55 = vsel %vm2466_vm1, %v2931_v49, 1.0  ;;  %v2143_v56 = vadd.f32 %v4398_v7, %v2142_v51 }
 0x2aa   :  { %2668 = vst [vmem:[#allocation2 + $0x40] sm:$0xff] %v2636_v47  ;;  %v2605_v57 = vmul.f32 %v2573_v55, %v2133_v40  ;;  %v2702_v58 = vmul.f32 %v2573_v55, %v2357_v35  ;;  %vm2480_vm0 = vcmp.gt.f32.partialorder %v2148_v50, 0.0 }
 0x2ab   :  { %v2639_v59 = vadd.f32 %v4409_v27, %v2606_v53  ;;  %2735 = vst [vmem:[#allocation4 + $0x58] sm:$0xff] %v2703_v54  ;;  %v2934_v60 = vsel %vm2480_vm0, 1.0, %v3812_v19  ;;  %vm2479_vm2 = vcmp.gt.f32.partialorder %v2143_v56, 0.0  ;;  %v3526_v61 = vpop.f32.mrb[78].mxu0  ;;  %v3606_v62 = vpop.f32.mrb[78].mxu1 }
 0x2ac   :  { %v2638_v63 = vadd.f32 %v4409_v27, %v2605_v57  ;;  %2734 = vst [vmem:[#allocation4 + $0x50] sm:$0xff] %v2702_v58  ;;  %v2576_v39 = vsel %vm2466_vm1, %v2934_v60, 1.0  ;;  %v2933_v0 = vsel %vm2479_vm2, 1.0, %v3812_v19  ;;  %v2158_v1 = vadd.f32 %v3526_v61, %v4398_v7  ;;  %v2152_v2 = vpop.f32.mrb[79].mxu0  ;;  %v2377_v3 = vpop.f32.mrb[79].mxu1 }
 0x2ad   :  { %2671 = vst [vmem:[#allocation2 + $0x58] sm:$0xff] %v2639_v59  ;;  %v2608_v4 = vmul.f32 %v2576_v39, %v2148_v50  ;;  %v2705_v8 = vmul.f32 %v3603_v46, %v2576_v39  ;;  %v2575_v9 = vsel %vm2466_vm1, %v2933_v0, 1.0  ;;  %v2153_v10 = vadd.f32 %v4398_v7, %v2152_v2 }
 0x2ae   :  { %2670 = vst [vmem:[#allocation2 + $0x50] sm:$0xff] %v2638_v63  ;;  %v2607_v11 = vmul.f32 %v2575_v9, %v2143_v56  ;;  %v2704_v12 = vmul.f32 %v2575_v9, %v2367_v52  ;;  %vm2482_vm3 = vcmp.gt.f32.partialorder %v2158_v1, 0.0 }
 0x2af   :  { %v2641_v13 = vadd.f32 %v4409_v27, %v2608_v4  ;;  %2737 = vst [vmem:[#allocation4 + $0x68] sm:$0xff] %v2705_v8  ;;  %v2936_v14 = vsel %vm2482_vm3, 1.0, %v3812_v19  ;;  %vm2481_vm4 = vcmp.gt.f32.partialorder %v2153_v10, 0.0  ;;  %v3529_v15 = vpop.f32.mrb[80].mxu0  ;;  %v3609_v16 = vpop.f32.mrb[80].mxu1 }
 0x2b0   :  { %v2640_v17 = vadd.f32 %v4409_v27, %v2607_v11  ;;  %2736 = vst [vmem:[#allocation4 + $0x60] sm:$0xff] %v2704_v12  ;;  %v2578_v18 = vsel %vm2466_vm1, %v2936_v14, 1.0  ;;  %v2935_v20 = vsel %vm2481_vm4, 1.0, %v3812_v19  ;;  %v2168_v21 = vadd.f32 %v3529_v15, %v4398_v7  ;;  %v2162_v22 = vpop.f32.mrb[81].mxu0  ;;  %v2387_v23 = vpop.f32.mrb[81].mxu1 }
 0x2b1   :  { %2673 = vst [vmem:[#allocation2 + $0x68] sm:$0xff] %v2641_v13  ;;  %v2610_v24 = vmul.f32 %v2578_v18, %v2158_v1  ;;  %v2707_v25 = vmul.f32 %v3606_v62, %v2578_v18  ;;  %v2577_v26 = vsel %vm2466_vm1, %v2935_v20, 1.0  ;;  %v2163_v5 = vadd.f32 %v4398_v7, %v2162_v22 }
 0x2b2   :  { %2672 = vst [vmem:[#allocation2 + $0x60] sm:$0xff] %v2640_v17  ;;  %v2609_v28 = vmul.f32 %v2577_v26, %v2153_v10  ;;  %v2706_v29 = vmul.f32 %v2577_v26, %v2377_v3  ;;  %vm2484_vm5 = vcmp.gt.f32.partialorder %v2168_v21, 0.0 }
 0x2b3   :  { %v2643_v30 = vadd.f32 %v4409_v27, %v2610_v24  ;;  %2739 = vst [vmem:[#allocation4 + $0x78] sm:$0xff] %v2707_v25  ;;  %v2938_v31 = vsel %vm2484_vm5, 1.0, %v3812_v19  ;;  %vm2483_vm6 = vcmp.gt.f32.partialorder %v2163_v5, 0.0  ;;  %v3532_v32 = vpop.f32.mrb[82].mxu0  ;;  %v3612_v33 = vpop.f32.mrb[82].mxu1 }
 0x2b4   :  { %v2642_v34 = vadd.f32 %v4409_v27, %v2609_v28  ;;  %2738 = vst [vmem:[#allocation4 + $0x70] sm:$0xff] %v2706_v29  ;;  %v2580_v35 = vsel %vm2466_vm1, %v2938_v31, 1.0  ;;  %v2937_v36 = vsel %vm2483_vm6, 1.0, %v3812_v19  ;;  %v2178_v37 = vadd.f32 %v3532_v32, %v4398_v7  ;;  %v2172_v38 = vpop.f32.mrb[83].mxu0  ;;  %v2397_v40 = vpop.f32.mrb[83].mxu1 }
 0x2b5   :  { %2675 = vst [vmem:[#allocation2 + $0x78] sm:$0xff] %v2643_v30  ;;  %v2612_v41 = vmul.f32 %v2580_v35, %v2168_v21  ;;  %v2709_v42 = vmul.f32 %v3609_v16, %v2580_v35  ;;  %v2579_v43 = vsel %vm2466_vm1, %v2937_v36, 1.0  ;;  %v2173_v44 = vadd.f32 %v4398_v7, %v2172_v38 }
 0x2b6   :  { %2674 = vst [vmem:[#allocation2 + $0x70] sm:$0xff] %v2642_v34  ;;  %v2611_v45 = vmul.f32 %v2579_v43, %v2163_v5  ;;  %v2708_v46 = vmul.f32 %v2579_v43, %v2387_v23  ;;  %vm2486_vm7 = vcmp.gt.f32.partialorder %v2178_v37, 0.0 }
 0x2b7   :  { %v2645_v47 = vadd.f32 %v4409_v27, %v2612_v41  ;;  %2741 = vst [vmem:[#allocation4 + $0x88] sm:$0xff] %v2709_v42  ;;  %v2940_v48 = vsel %vm2486_vm7, 1.0, %v3812_v19  ;;  %vm2485_vm8 = vcmp.gt.f32.partialorder %v2173_v44, 0.0  ;;  %v3535_v49 = vpop.f32.mrb[84].mxu0  ;;  %v3615_v50 = vpop.f32.mrb[84].mxu1 }
 0x2b8   :  { %v2644_v51 = vadd.f32 %v4409_v27, %v2611_v45  ;;  %2740 = vst [vmem:[#allocation4 + $0x80] sm:$0xff] %v2708_v46  ;;  %v2582_v52 = vsel %vm2466_vm1, %v2940_v48, 1.0  ;;  %v2939_v53 = vsel %vm2485_vm8, 1.0, %v3812_v19  ;;  %v2188_v54 = vadd.f32 %v3535_v49, %v4398_v7  ;;  %v2182_v55 = vpop.f32.mrb[85].mxu0  ;;  %v2407_v56 = vpop.f32.mrb[85].mxu1 }
 0x2b9   :  { %2677 = vst [vmem:[#allocation2 + $0x88] sm:$0xff] %v2645_v47  ;;  %v2614_v57 = vmul.f32 %v2582_v52, %v2178_v37  ;;  %v2711_v58 = vmul.f32 %v3612_v33, %v2582_v52  ;;  %v2581_v59 = vsel %vm2466_vm1, %v2939_v53, 1.0  ;;  %v2183_v60 = vadd.f32 %v4398_v7, %v2182_v55 }
 0x2ba   :  { %2676 = vst [vmem:[#allocation2 + $0x80] sm:$0xff] %v2644_v51  ;;  %v2613_v61 = vmul.f32 %v2581_v59, %v2173_v44  ;;  %v2710_v62 = vmul.f32 %v2581_v59, %v2397_v40  ;;  %vm2488_vm9 = vcmp.gt.f32.partialorder %v2188_v54, 0.0 }
 0x2bb   :  { %v2647_v63 = vadd.f32 %v4409_v27, %v2614_v57  ;;  %2743 = vst [vmem:[#allocation4 + $0x98] sm:$0xff] %v2711_v58  ;;  %v2942_v39 = vsel %vm2488_vm9, 1.0, %v3812_v19  ;;  %vm2487_vm10 = vcmp.gt.f32.partialorder %v2183_v60, 0.0  ;;  %v3538_v0 = vpop.f32.mrb[86].mxu0  ;;  %v3618_v1 = vpop.f32.mrb[86].mxu1 }
 0x2bc   :  { %v2646_v2 = vadd.f32 %v4409_v27, %v2613_v61  ;;  %2742 = vst [vmem:[#allocation4 + $0x90] sm:$0xff] %v2710_v62  ;;  %v2584_v3 = vsel %vm2466_vm1, %v2942_v39, 1.0  ;;  %v2941_v4 = vsel %vm2487_vm10, 1.0, %v3812_v19  ;;  %v2198_v8 = vadd.f32 %v3538_v0, %v4398_v7  ;;  %v2192_v9 = vpop.f32.mrb[87].mxu0  ;;  %v2417_v10 = vpop.f32.mrb[87].mxu1 }
 0x2bd   :  { %2679 = vst [vmem:[#allocation2 + $0x98] sm:$0xff] %v2647_v63  ;;  %v2616_v11 = vmul.f32 %v2584_v3, %v2188_v54  ;;  %v2713_v12 = vmul.f32 %v3615_v50, %v2584_v3  ;;  %v2583_v13 = vsel %vm2466_vm1, %v2941_v4, 1.0  ;;  %v2193_v14 = vadd.f32 %v4398_v7, %v2192_v9 }
 0x2be   :  { %2678 = vst [vmem:[#allocation2 + $0x90] sm:$0xff] %v2646_v2  ;;  %v2615_v15 = vmul.f32 %v2583_v13, %v2183_v60  ;;  %v2712_v16 = vmul.f32 %v2583_v13, %v2407_v56  ;;  %vm2490_vm11 = vcmp.gt.f32.partialorder %v2198_v8, 0.0 }
 0x2bf   :  { %v2649_v17 = vadd.f32 %v4409_v27, %v2616_v11  ;;  %2745 = vst [vmem:[#allocation4 + $0xa8] sm:$0xff] %v2713_v12  ;;  %v2944_v18 = vsel %vm2490_vm11, 1.0, %v3812_v19  ;;  %vm2489_vm12 = vcmp.gt.f32.partialorder %v2193_v14, 0.0  ;;  %v3541_v20 = vpop.f32.mrb[88].mxu0  ;;  %v3621_v21 = vpop.f32.mrb[88].mxu1 }
 0x2c0   :  { %v2648_v22 = vadd.f32 %v4409_v27, %v2615_v15  ;;  %2744 = vst [vmem:[#allocation4 + $0xa0] sm:$0xff] %v2712_v16  ;;  %v2586_v23 = vsel %vm2466_vm1, %v2944_v18, 1.0  ;;  %v2943_v24 = vsel %vm2489_vm12, 1.0, %v3812_v19  ;;  %v2208_v25 = vadd.f32 %v3541_v20, %v4398_v7  ;;  %v2202_v26 = vpop.f32.mrb[89].mxu0  ;;  %v2427_v5 = vpop.f32.mrb[89].mxu1 }
 0x2c1   :  { %2681 = vst [vmem:[#allocation2 + $0xa8] sm:$0xff] %v2649_v17  ;;  %v2618_v28 = vmul.f32 %v2586_v23, %v2198_v8  ;;  %v2715_v29 = vmul.f32 %v3618_v1, %v2586_v23  ;;  %v2585_v30 = vsel %vm2466_vm1, %v2943_v24, 1.0  ;;  %v2203_v31 = vadd.f32 %v4398_v7, %v2202_v26 }
 0x2c2   :  { %2680 = vst [vmem:[#allocation2 + $0xa0] sm:$0xff] %v2648_v22  ;;  %v2617_v32 = vmul.f32 %v2585_v30, %v2193_v14  ;;  %v2714_v33 = vmul.f32 %v2585_v30, %v2417_v10  ;;  %vm2492_vm13 = vcmp.gt.f32.partialorder %v2208_v25, 0.0 }
 0x2c3   :  { %v2651_v34 = vadd.f32 %v4409_v27, %v2618_v28  ;;  %2747 = vst [vmem:[#allocation4 + $0xb8] sm:$0xff] %v2715_v29  ;;  %v2946_v35 = vsel %vm2492_vm13, 1.0, %v3812_v19  ;;  %vm2491_vm14 = vcmp.gt.f32.partialorder %v2203_v31, 0.0  ;;  %v3544_v36 = vpop.f32.mrb[90].mxu0  ;;  %v3624_v37 = vpop.f32.mrb[90].mxu1 }
 0x2c4   :  { %v2650_v38 = vadd.f32 %v4409_v27, %v2617_v32  ;;  %2746 = vst [vmem:[#allocation4 + $0xb0] sm:$0xff] %v2714_v33  ;;  %v2588_v40 = vsel %vm2466_vm1, %v2946_v35, 1.0  ;;  %v2945_v41 = vsel %vm2491_vm14, 1.0, %v3812_v19  ;;  %v2218_v42 = vadd.f32 %v3544_v36, %v4398_v7  ;;  %v2212_v43 = vpop.f32.mrb[91].mxu0  ;;  %v2437_v44 = vpop.f32.mrb[91].mxu1 }
 0x2c5   :  { %2683 = vst [vmem:[#allocation2 + $0xb8] sm:$0xff] %v2651_v34  ;;  %v2620_v45 = vmul.f32 %v2588_v40, %v2208_v25  ;;  %v2717_v46 = vmul.f32 %v3621_v21, %v2588_v40  ;;  %v2587_v47 = vsel %vm2466_vm1, %v2945_v41, 1.0  ;;  %v2213_v48 = vadd.f32 %v4398_v7, %v2212_v43 }
 0x2c6   :  { %2682 = vst [vmem:[#allocation2 + $0xb0] sm:$0xff] %v2650_v38  ;;  %v2619_v49 = vmul.f32 %v2587_v47, %v2203_v31  ;;  %v2716_v50 = vmul.f32 %v2587_v47, %v2427_v5  ;;  %vm2494_vm15 = vcmp.gt.f32.partialorder %v2218_v42, 0.0 }
 0x2c7   :  { %v2653_v51 = vadd.f32 %v4409_v27, %v2620_v45  ;;  %2749 = vst [vmem:[#allocation4 + $0xc8] sm:$0xff] %v2717_v46  ;;  %v2948_v52 = vsel %vm2494_vm15, 1.0, %v3812_v19  ;;  %vm2493_vm0 = vcmp.gt.f32.partialorder %v2213_v48, 0.0  ;;  %v3547_v53 = vpop.f32.mrb[92].mxu0  ;;  %v3627_v54 = vpop.f32.mrb[92].mxu1 }
 0x2c8   :  { %v2652_v55 = vadd.f32 %v4409_v27, %v2619_v49  ;;  %2748 = vst [vmem:[#allocation4 + $0xc0] sm:$0xff] %v2716_v50  ;;  %v2590_v56 = vsel %vm2466_vm1, %v2948_v52, 1.0  ;;  %v2947_v57 = vsel %vm2493_vm0, 1.0, %v3812_v19  ;;  %v2228_v58 = vadd.f32 %v3547_v53, %v4398_v7  ;;  %v2222_v59 = vpop.f32.mrb[93].mxu0  ;;  %v2447_v60 = vpop.f32.mrb[93].mxu1 }
 0x2c9   :  { %2685 = vst [vmem:[#allocation2 + $0xc8] sm:$0xff] %v2653_v51  ;;  %v2622_v61 = vmul.f32 %v2590_v56, %v2218_v42  ;;  %v2719_v62 = vmul.f32 %v3624_v37, %v2590_v56  ;;  %v2589_v63 = vsel %vm2466_vm1, %v2947_v57, 1.0  ;;  %v2223_v39 = vadd.f32 %v4398_v7, %v2222_v59 }
 0x2ca   :  { %2684 = vst [vmem:[#allocation2 + $0xc0] sm:$0xff] %v2652_v55  ;;  %v2621_v0 = vmul.f32 %v2589_v63, %v2213_v48  ;;  %v2718_v1 = vmul.f32 %v2589_v63, %v2437_v44  ;;  %vm2496_vm2 = vcmp.gt.f32.partialorder %v2228_v58, 0.0 }
 0x2cb   :  { %v2655_v2 = vadd.f32 %v4409_v27, %v2622_v61  ;;  %2751 = vst [vmem:[#allocation4 + $0xd8] sm:$0xff] %v2719_v62  ;;  %v2950_v3 = vsel %vm2496_vm2, 1.0, %v3812_v19  ;;  %vm2495_vm3 = vcmp.gt.f32.partialorder %v2223_v39, 0.0  ;;  %v3550_v4 = vpop.f32.mrb[94].mxu0  ;;  %v3630_v8 = vpop.f32.mrb[94].mxu1 }
 0x2cc   :  { %v2654_v9 = vadd.f32 %v4409_v27, %v2621_v0  ;;  %2750 = vst [vmem:[#allocation4 + $0xd0] sm:$0xff] %v2718_v1  ;;  %v2592_v10 = vsel %vm2466_vm1, %v2950_v3, 1.0  ;;  %v2949_v11 = vsel %vm2495_vm3, 1.0, %v3812_v19  ;;  %v2238_v12 = vadd.f32 %v3550_v4, %v4398_v7  ;;  %v2232_v13 = vpop.f32.mrb[95].mxu0  ;;  %v2457_v14 = vpop.f32.mrb[95].mxu1 }
 0x2cd   :  { %2687 = vst [vmem:[#allocation2 + $0xd8] sm:$0xff] %v2655_v2  ;;  %v2624_v15 = vmul.f32 %v2592_v10, %v2228_v58  ;;  %v2721_v16 = vmul.f32 %v3627_v54, %v2592_v10  ;;  %v2591_v17 = vsel %vm2466_vm1, %v2949_v11, 1.0  ;;  %v2233_v18 = vadd.f32 %v4398_v7, %v2232_v13 }
 0x2ce   :  { %2686 = vst [vmem:[#allocation2 + $0xd0] sm:$0xff] %v2654_v9  ;;  %v2623_v20 = vmul.f32 %v2591_v17, %v2223_v39  ;;  %v2720_v21 = vmul.f32 %v2591_v17, %v2447_v60  ;;  %vm2498_vm4 = vcmp.gt.f32.partialorder %v2238_v12, 0.0 }
 0x2cf   :  { %v2657_v22 = vadd.f32 %v4409_v27, %v2624_v15  ;;  %2753 = vst [vmem:[#allocation4 + $0xe8] sm:$0xff] %v2721_v16  ;;  %v2952_v23 = vsel %vm2498_vm4, 1.0, %v3812_v19  ;;  %vm2497_vm5 = vcmp.gt.f32.partialorder %v2233_v18, 0.0 }
 0x2d0   :  { %v2656_v24 = vadd.f32 %v4409_v27, %v2623_v20  ;;  %2752 = vst [vmem:[#allocation4 + $0xe0] sm:$0xff] %v2720_v21  ;;  %v2594_v25 = vsel %vm2466_vm1, %v2952_v23, 1.0  ;;  %v2951_v7 = vsel %vm2497_vm5, 1.0, %v3812_v19 }
 0x2d1   :  { %2689 = vst [vmem:[#allocation2 + $0xe8] sm:$0xff] %v2657_v22  ;;  %v2626_v26 = vmul.f32 %v2594_v25, %v2238_v12  ;;  %v2723_v5 = vmul.f32 %v3630_v8, %v2594_v25  ;;  %v2593_v28 = vsel %vm2466_vm1, %v2951_v7, 1.0 }
 0x2d2   :  { %2688 = vst [vmem:[#allocation2 + $0xe0] sm:$0xff] %v2656_v24  ;;  %v2625_v29 = vmul.f32 %v2593_v28, %v2233_v18  ;;  %v2722_v30 = vmul.f32 %v2593_v28, %v2457_v14 }
 0x2d3   :  { %v2659_v31 = vadd.f32 %v4409_v27, %v2626_v26  ;;  %2755 = vst [vmem:[#allocation4 + $0xf8] sm:$0xff] %v2723_v5 }
 0x2d4   :  { %v2658_v32 = vadd.f32 %v4409_v27, %v2625_v29  ;;  %2754 = vst [vmem:[#allocation4 + $0xf0] sm:$0xff] %v2722_v30 }
 0x2d5   :  { %2691 = vst [vmem:[#allocation2 + $0xf8] sm:$0xff] %v2659_v31 }
 0x2d6   :  { %3775 = shalt.err (!%p3772_p4)
}
 0x2d7   :  { %s3776_s23 = scalar_lea.hbm %s4605_s8, 4096 }
 0x2d8   :  { %p3777_p5 = scmp.ne.s32.totalorder %s4605_s8, %s3776_s23  ;;  %p3780_p6 = scmp.lt.u32.totalorder %s3776_s23, %s4605_s8 }
 0x2da   :  { %p3782_p7 = pnand %p3780_p6, %p3777_p5 }
 0x2dc   :  { %3785 = shalt.err (!%p3782_p7)
}
 0x2dd   :  { %s3815_s28 = smov 128   ;;  %s3816_s0 = smov 8   ;;  %2690 = vst [vmem:[#allocation2 + $0xf0] sm:$0xff] %v2658_v32 }
 0x2de   :  { %2779 = dma.vmem_to_hbm [thread:$0]  %s2774_s2, 4096, %s4605_s8, [#allocation5], %s3815_s28, %s3815_s28, %s3816_s0  }
 0x2df   :  { %s3786_s9 = scalar_lea.vmem %s4566_s19, 4096  ;;  %p3791_p9 = scmp.lt.s32.totalorder %s4566_s19, %s4566_s19 }
 0x2e0   :  { %p3787_p8 = scmp.ne.s32.totalorder %s4566_s19, %s3786_s9  ;;  %p3792_p10 = scmp.lt.s32.totalorder %s3786_s9, %s3786_s9 }
 0x2e2   :  { %p3793_p11 = por %p3792_p10, %p3791_p9 }
 0x2e4   :  { %p3794_p12 = pnand %p3793_p11, %p3787_p8 }
 0x2e6   :  { %3797 = shalt.err (!%p3794_p12)
}
 0x2e7   :  { %s3798_s12 = scalar_lea.hbm %s4604_s7, 4096 }
 0x2e8   :  { %p3799_p13 = scmp.ne.s32.totalorder %s4604_s7, %s3798_s12  ;;  %p3802_p0 = scmp.lt.u32.totalorder %s3798_s12, %s4604_s7 }
 0x2ea   :  { %p3804_p1 = pnand %p3802_p0, %p3799_p13 }
 0x2ec   :  { %3807 = shalt.err (!%p3804_p1)
}
 0x2ed   :  { %2767 = dma.vmem_to_hbm [thread:$0]  %s4566_s19, 4096, %s4604_s7, [#allocation3], %s3815_s28, %s3815_s28, %s3816_s0  }
 0x2ee   :  { %3808 = dma.done.wait [#allocation3], 4096  }
 0x2ef   :  { %3809 = vsyncadd [#allocation3], 4294963200 }
 0x2f0   :  { %3810 = dma.done.wait [#allocation5], 4096  }
 0x2f1   :  { %3811 = vsyncadd [#allocation5], 4294963200 }
 0x2f2   :  { %2786 = vsyncpa [#allocation3], 1 }
 0x2f3   :  { %2787 = vsyncpa [#allocation5], 1 }

</bundles_post_ra>
